<compile_context>
chip_gen: v7x
topology: tpu7x:2x2x1
jax: 0.10.0
libtpu: 0.0.40
codegen_flags: <defaults>
</compile_context>

<pallas_src>
import jax
import jax.numpy as jnp
from jax import lax
from jax.experimental import pallas as pl
from jax.experimental.pallas import tpu as pltpu


def _make_kernel(T, N, H, F_in, F_out):
    G = 4 * H

    def kernel(x_ref, tar_ref,
               w1_ref, b1_ref,
               wgx_ref, bgx_ref,
               whh_e_ref, whh_d_ref,
               w3_ref, b3_ref,
               tra_ref, loss_ref,
               gx_ref, dec_h_ref):
        # ---- prologue: pro1 + ReLU, then ONE folded input->gate matmul
        x = x_ref[...]                                                     # (T*N, F_in)
        h1 = jnp.dot(x, w1_ref[...], preferred_element_type=jnp.float32) + b1_ref[...]
        h1 = jnp.maximum(h1, 0.0)
        # gx[:, :G] = enc @ wih_e + b_e ; gx[:, G:] = enc @ wih_d + b_d
        # (i/f/o columns already pre-scaled by 0.5 for the tanh-form sigmoid)
        gx = jnp.dot(h1, wgx_ref[...], preferred_element_type=jnp.float32) + bgx_ref[...]
        gx_ref[...] = gx          # park in VMEM; loops re-load (N, 4H) slices

        # Lane constants for the tanh-form sigmoid (hoisted out of the loops):
        #   i/f/o pre-activations arrive scaled by 0.5, so sigmoid(z) = 0.5*tanh(z/2)+0.5
        #   g stays tanh(g).
        lane = lax.broadcasted_iota(jnp.int32, (1, G), 1)
        is_g = (lane >= 2 * H) & (lane < 3 * H)
        act_a = jnp.where(is_g, 1.0, 0.5).astype(jnp.float32)
        act_b = jnp.where(is_g, 0.0, 0.5).astype(jnp.float32)

        def lstm_step(gx_t, h, c, whh):
            pre = gx_t + jnp.dot(h, whh, preferred_element_type=jnp.float32)   # (N, 4H)
            act = jnp.tanh(pre) * act_a + act_b     # [sig(i) | sig(f) | tanh(g) | sig(o)]
            i = act[:, 0 * H:1 * H]
            f = act[:, 1 * H:2 * H]
            g = act[:, 2 * H:3 * H]
            o = act[:, 3 * H:4 * H]
            c_new = f * c + i * g
            h_new = o * jnp.tanh(c_new)
            return h_new, c_new

        # ---- encoder recurrence: only the final (h, c) state is needed
        whh_e = whh_e_ref[...]                                              # (H, 4H)
        h = jnp.zeros((N, H), jnp.float32)
        c = jnp.zeros((N, H), jnp.float32)
        for t in range(T):                       # static trip count -> fully unrolled
            h, c = lstm_step(gx_ref[t * N:(t + 1) * N, 0:G], h, c, whh_e)

        # ---- decoder recurrence: seeded from encoder final state, same enc input
        whh_d = whh_d_ref[...]                                              # (H, 4H)
        for t in range(T):
            h, c = lstm_step(gx_ref[t * N:(t + 1) * N, G:2 * G], h, c, whh_d)
            dec_h_ref[t * N:(t + 1) * N, :] = h     # store is off the serial chain

        # ---- pro3 + Traj_loss, fused epilogue
        dec_h = dec_h_ref[...]                                              # (T*N, H)
        tra = jnp.dot(dec_h, w3_ref[...], preferred_element_type=jnp.float32) + b3_ref[...]
        tra_ref[...] = tra

        diff = tra - tar_ref[...]
        row_norm = jnp.sqrt(jnp.sum(diff * diff, axis=-1, keepdims=True))   # (T*N, 1)
        # Traj_loss: sqrt-sum over feats -> sum over (t, n) -> / N ; scalar to SMEM
        loss_ref[0] = jnp.sum(row_norm) * (1.0 / N)

    return kernel


def _fold_params(params):
    """Offline algebra: fold pro2 into both LSTMs' input->gate weights and
    pre-scale the i/f/o gate columns by 0.5 for the tanh-form sigmoid."""
    H = params["w2"].shape[0]
    f32 = jnp.float32
    wih = jnp.concatenate([params["wih_e"], params["wih_d"]], axis=1).astype(f32)  # (H, 8H)
    bih = jnp.concatenate([params["b_e"], params["b_d"]], axis=1).astype(f32)      # (1, 8H)
    w_gx = params["w2"].astype(f32) @ wih                                          # (H, 8H)
    b_gx = params["b2"].astype(f32) @ wih + bih                                    # (1, 8H)

    half = jnp.full((H,), 0.5, f32)
    one = jnp.ones((H,), f32)
    gate_scale = jnp.concatenate([half, half, one, half])          # (4H,)  i f g o
    scale2 = jnp.concatenate([gate_scale, gate_scale])             # (8H,)
    w_gx = w_gx * scale2[None, :]
    b_gx = b_gx * scale2[None, :]
    whh_e = params["whh_e"].astype(f32) * gate_scale[None, :]
    whh_d = params["whh_d"].astype(f32) * gate_scale[None, :]
    return w_gx, b_gx, whh_e, whh_d


def seq2seq_forward(batch_in, tar_y, params):
    """batch_in: (T, N, F_in), tar_y: (T, N, F_out) -> (tra (T,N,F_out), loss scalar)."""
    T, N, F_in = batch_in.shape
    F_out = tar_y.shape[-1]
    H = params["w2"].shape[0]

    x2d = batch_in.reshape(T * N, F_in).astype(jnp.float32)
    tar2d = tar_y.reshape(T * N, F_out).astype(jnp.float32)

    w_gx, b_gx, whh_e, whh_d = _fold_params(params)

    operands = (
        x2d, tar2d,
        params["w1"].astype(jnp.float32), params["b1"].astype(jnp.float32),
        w_gx, b_gx,
        whh_e, whh_d,
        params["w3"].astype(jnp.float32), params["b3"].astype(jnp.float32),
    )

    def vmem_spec(shape):
        return pl.BlockSpec(shape, lambda: (0,) * len(shape))

    kernel = _make_kernel(T, N, H, F_in, F_out)

    tra2d, loss = pl.pallas_call(
        kernel,
        out_shape=(
            jax.ShapeDtypeStruct((T * N, F_out), jnp.float32),
            jax.ShapeDtypeStruct((1,), jnp.float32),
        ),
        in_specs=[vmem_spec(op.shape) for op in operands],
        out_specs=(
            vmem_spec((T * N, F_out)),
            pl.BlockSpec(memory_space=pltpu.MemorySpace.SMEM),
        ),
        scratch_shapes=[
            pltpu.VMEM((T * N, 8 * H), jnp.float32),   # gx = [encoder gates | decoder gates]
            pltpu.VMEM((T * N, H), jnp.float32),       # decoder hidden states
        ],
    )(*operands)

    return tra2d.reshape(T, N, F_out), loss[0]


def _sigmoid(x):
    return 1.0 / (1.0 + jnp.exp(-x))


def seq2seq_ref(batch_in, tar_y, params):
    """Pure-JAX reference mirroring the PyTorch forward exactly (no folding)."""
    T, N, F_in = batch_in.shape
    H = params["w2"].shape[0]

    x = batch_in.reshape(T * N, F_in)
    h1 = jnp.maximum(x @ params["w1"] + params["b1"], 0.0)
    enc = (h1 @ params["w2"] + params["b2"]).reshape(T, N, H)

    def run_lstm(seq, wih, whh, b, h0, c0):
        def step(carry, x_t):
            h, c = carry
            gates = x_t @ wih + h @ whh + b
            i = _sigmoid(gates[:, 0 * H:1 * H])
            f = _sigmoid(gates[:, 1 * H:2 * H])
            g = jnp.tanh(gates[:, 2 * H:3 * H])
            o = _sigmoid(gates[:, 3 * H:4 * H])
            c = f * c + i * g
            h = o * jnp.tanh(c)
            return (h, c), h
        (hT, cT), hs = lax.scan(step, (h0, c0), seq)
        return hs, (hT, cT)

    z = jnp.zeros((N, H), jnp.float32)
    _, (hT, cT) = run_lstm(enc, params["wih_e"], params["whh_e"], params["b_e"], z, z)
    dec_hs, _ = run_lstm(enc, params["wih_d"], params["whh_d"], params["b_d"], hT, cT)

    tra = dec_hs.reshape(T * N, H) @ params["w3"] + params["b3"]
    tra = tra.reshape(T, N, -1)
    rmse = jnp.sqrt(jnp.sum((tra - tar_y) ** 2, axis=-1)).sum(axis=0)
    return tra, rmse.mean()


if __name__ == "__main__":
    OBS_LEN = 8
    PRED_LEN = 8          # Traj_loss broadcast requires pred_length == obs_length
    N_AGENTS = 16
    F_IN = 4
    F_HID = 32            # 4H = 128 -> lane-dense gate layout, 8H = 256 folded matmul
    F_OUT = 2

    key = jax.random.PRNGKey(0)
    keys = jax.random.split(key, 13)

    # inputs[0]: (obs+pred, N, F_IN) time-major trajectory tensor
    full = jax.random.normal(keys[0], (OBS_LEN + PRED_LEN, N_AGENTS, F_IN), jnp.float32)
    batch_in = full[:OBS_LEN, :, :F_IN]
    tar_y = full[OBS_LEN:, :, :F_OUT]

    def rnd(k, shape, scale=0.3):
        return scale * jax.random.normal(k, shape, jnp.float32)

    # Parameters in (in, out) layout (equivalent to torch Linear/LSTM with W.T);
    # the two LSTM biases (b_ih + b_hh) are folded into a single bias per LSTM.
    params = dict(
        w1=rnd(keys[1], (F_IN, F_HID)),           b1=rnd(keys[2], (1, F_HID)),
        w2=rnd(keys[3], (F_HID, F_HID)),          b2=rnd(keys[4], (1, F_HID)),
        wih_e=rnd(keys[5], (F_HID, 4 * F_HID)),   whh_e=rnd(keys[6], (F_HID, 4 * F_HID)),
        b_e=rnd(keys[7], (1, 4 * F_HID)),
        wih_d=rnd(keys[8], (F_HID, 4 * F_HID)),   whh_d=rnd(keys[9], (F_HID, 4 * F_HID)),
        b_d=rnd(keys[10], (1, 4 * F_HID)),
        w3=rnd(keys[11], (F_HID, F_OUT)),         b3=rnd(keys[12], (1, F_OUT)),
    )

    fwd = jax.jit(seq2seq_forward)
    tra, loss = fwd(batch_in, tar_y, params)
    jax.block_until_ready((tra, loss))

    tra_ref, loss_ref = seq2seq_ref(batch_in, tar_y, params)
    assert tra.shape == (OBS_LEN, N_AGENTS, F_OUT)
    assert jnp.allclose(tra, tra_ref, atol=2e-3, rtol=2e-3), "trajectory mismatch vs reference"
    assert jnp.allclose(loss, loss_ref, atol=2e-3, rtol=2e-3), "loss mismatch vs reference"

    print("KERNEL_OK")
</pallas_src>

<mosaic_0001>
module attributes {stable_mosaic.version = 11 : i64} {
  func.func @kernel(%arg0: memref<128x4xf32, #tpu.memory_space<vmem>>, %arg1: memref<128x2xf32, #tpu.memory_space<vmem>>, %arg2: memref<4x32xf32, #tpu.memory_space<vmem>>, %arg3: memref<1x32xf32, #tpu.memory_space<vmem>>, %arg4: memref<32x256xf32, #tpu.memory_space<vmem>>, %arg5: memref<1x256xf32, #tpu.memory_space<vmem>>, %arg6: memref<32x128xf32, #tpu.memory_space<vmem>>, %arg7: memref<32x128xf32, #tpu.memory_space<vmem>>, %arg8: memref<32x2xf32, #tpu.memory_space<vmem>>, %arg9: memref<1x2xf32, #tpu.memory_space<vmem>>, %arg10: memref<128x2xf32, #tpu.memory_space<vmem>>, %arg11: memref<1xf32, #tpu.memory_space<smem>>, %arg12: memref<128x256xf32, #tpu.memory_space<vmem>>, %arg13: memref<128x32xf32, #tpu.memory_space<vmem>>) attributes {dimension_semantics = [], scalar_prefetch = 0 : i64, scratch_operands = 2 : i64, tpu.core_type = #tpu.core_type<tc>} {
    %c0 = arith.constant 0 : index
    %c0_0 = arith.constant 0 : index
    %0 = vector.load %arg0[%c0, %c0_0] : memref<128x4xf32, #tpu.memory_space<vmem>>, vector<128x4xf32>
    %c0_1 = arith.constant 0 : index
    %c0_2 = arith.constant 0 : index
    %1 = vector.load %arg2[%c0_1, %c0_2] : memref<4x32xf32, #tpu.memory_space<vmem>>, vector<4x32xf32>
    %cst = arith.constant dense<0.000000e+00> : vector<128x32xf32>
    %2 = tpu.matmul %0, %1, %cst {dimension_numbers = #tpu.dot_dimension_numbers<[1], [0], [0], [1], [0, 0, 1, 1], [], []>} : vector<128x4xf32>, vector<4x32xf32>, vector<128x32xf32> -> vector<128x32xf32>
    %c0_3 = arith.constant 0 : index
    %c0_4 = arith.constant 0 : index
    %3 = vector.load %arg3[%c0_3, %c0_4] : memref<1x32xf32, #tpu.memory_space<vmem>>, vector<1x32xf32>
    %4 = vector.broadcast %3 : vector<1x32xf32> to vector<128x32xf32>
    %5 = arith.addf %2, %4 : vector<128x32xf32>
    %cst_5 = arith.constant 0.000000e+00 : f32
    %6 = vector.broadcast %cst_5 : f32 to vector<128x32xf32>
    %7 = arith.maximumf %5, %6 : vector<128x32xf32>
    %c0_6 = arith.constant 0 : index
    %c0_7 = arith.constant 0 : index
    %8 = vector.load %arg4[%c0_6, %c0_7] : memref<32x256xf32, #tpu.memory_space<vmem>>, vector<32x256xf32>
    %cst_8 = arith.constant dense<0.000000e+00> : vector<128x256xf32>
    %9 = tpu.matmul %7, %8, %cst_8 {dimension_numbers = #tpu.dot_dimension_numbers<[1], [0], [0], [1], [0, 0, 1, 1], [], []>} : vector<128x32xf32>, vector<32x256xf32>, vector<128x256xf32> -> vector<128x256xf32>
    %c0_9 = arith.constant 0 : index
    %c0_10 = arith.constant 0 : index
    %10 = vector.load %arg5[%c0_9, %c0_10] : memref<1x256xf32, #tpu.memory_space<vmem>>, vector<1x256xf32>
    %11 = vector.broadcast %10 : vector<1x256xf32> to vector<128x256xf32>
    %12 = arith.addf %9, %11 : vector<128x256xf32>
    %c0_11 = arith.constant 0 : index
    %c0_12 = arith.constant 0 : index
    %13 = vector.load %arg12[%c0_11, %c0_12] : memref<128x256xf32, #tpu.memory_space<vmem>>, vector<128x256xf32>
    tpu.vector_store %arg12[%c0_11, %c0_12], %12 {strides = array<i32>} : memref<128x256xf32, #tpu.memory_space<vmem>>, vector<128x256xf32>,
    %14 = tpu.iota {dimensions = array<i32: 1>} : vector<1x128xi32>
    %c64_i32 = arith.constant 64 : i32
    %15 = vector.broadcast %c64_i32 : i32 to vector<1x128xi32>
    %16 = arith.cmpi sge, %14, %15 : vector<1x128xi32>
    %c96_i32 = arith.constant 96 : i32
    %17 = vector.broadcast %c96_i32 : i32 to vector<1x128xi32>
    %18 = arith.cmpi slt, %14, %17 : vector<1x128xi32>
    %19 = arith.andi %16, %18 : vector<1x128xi1>
    %cst_13 = arith.constant 1.000000e+00 : f32
    %cst_14 = arith.constant 5.000000e-01 : f32
    %20 = vector.broadcast %cst_13 : f32 to vector<1x128xf32>
    %21 = vector.broadcast %cst_14 : f32 to vector<1x128xf32>
    %22 = arith.select %19, %20, %21 : vector<1x128xi1>, vector<1x128xf32>
    %cst_15 = arith.constant 0.000000e+00 : f32
    %cst_16 = arith.constant 5.000000e-01 : f32
    %23 = vector.broadcast %cst_15 : f32 to vector<1x128xf32>
    %24 = vector.broadcast %cst_16 : f32 to vector<1x128xf32>
    %25 = arith.select %19, %23, %24 : vector<1x128xi1>, vector<1x128xf32>
    %c0_17 = arith.constant 0 : index
    %c0_18 = arith.constant 0 : index
    %26 = vector.load %arg6[%c0_17, %c0_18] : memref<32x128xf32, #tpu.memory_space<vmem>>, vector<32x128xf32>
    %cst_19 = arith.constant 0.000000e+00 : f32
    %27 = vector.broadcast %cst_19 : f32 to vector<16x32xf32>
    %cst_20 = arith.constant 0.000000e+00 : f32
    %28 = vector.broadcast %cst_20 : f32 to vector<16x32xf32>
    %c0_21 = arith.constant 0 : index
    %c0_22 = arith.constant 0 : index
    %29 = vector.load %arg12[%c0_21, %c0_22] : memref<128x256xf32, #tpu.memory_space<vmem>>, vector<16x128xf32>
    %cst_23 = arith.constant dense<0.000000e+00> : vector<16x128xf32>
    %30 = tpu.matmul %27, %26, %cst_23 {dimension_numbers = #tpu.dot_dimension_numbers<[1], [0], [0], [1], [0, 0, 1, 1], [], []>} : vector<16x32xf32>, vector<32x128xf32>, vector<16x128xf32> -> vector<16x128xf32>
    %31 = arith.addf %29, %30 : vector<16x128xf32>
    %32 = math.tanh %31 : vector<16x128xf32>
    %33 = vector.broadcast %22 : vector<1x128xf32> to vector<16x128xf32>
    %34 = arith.mulf %32, %33 : vector<16x128xf32>
    %35 = vector.broadcast %25 : vector<1x128xf32> to vector<16x128xf32>
    %36 = arith.addf %34, %35 : vector<16x128xf32>
    %37 = vector.extract_strided_slice %36 {offsets = [0, 0], sizes = [16, 32], strides = [1, 1]} : vector<16x128xf32> to vector<16x32xf32>
    %38 = vector.extract_strided_slice %36 {offsets = [0, 32], sizes = [16, 32], strides = [1, 1]} : vector<16x128xf32> to vector<16x32xf32>
    %39 = vector.extract_strided_slice %36 {offsets = [0, 64], sizes = [16, 32], strides = [1, 1]} : vector<16x128xf32> to vector<16x32xf32>
    %40 = vector.extract_strided_slice %36 {offsets = [0, 96], sizes = [16, 32], strides = [1, 1]} : vector<16x128xf32> to vector<16x32xf32>
    %41 = arith.mulf %38, %28 : vector<16x32xf32>
    %42 = arith.mulf %37, %39 : vector<16x32xf32>
    %43 = arith.addf %41, %42 : vector<16x32xf32>
    %44 = math.tanh %43 : vector<16x32xf32>
    %45 = arith.mulf %40, %44 : vector<16x32xf32>
    %c16 = arith.constant 16 : index
    %c0_24 = arith.constant 0 : index
    %46 = vector.load %arg12[%c16, %c0_24] : memref<128x256xf32, #tpu.memory_space<vmem>>, vector<16x128xf32>
    %cst_25 = arith.constant dense<0.000000e+00> : vector<16x128xf32>
    %47 = tpu.matmul %45, %26, %cst_25 {dimension_numbers = #tpu.dot_dimension_numbers<[1], [0], [0], [1], [0, 0, 1, 1], [], []>} : vector<16x32xf32>, vector<32x128xf32>, vector<16x128xf32> -> vector<16x128xf32>
    %48 = arith.addf %46, %47 : vector<16x128xf32>
    %49 = math.tanh %48 : vector<16x128xf32>
    %50 = vector.broadcast %22 : vector<1x128xf32> to vector<16x128xf32>
    %51 = arith.mulf %49, %50 : vector<16x128xf32>
    %52 = vector.broadcast %25 : vector<1x128xf32> to vector<16x128xf32>
    %53 = arith.addf %51, %52 : vector<16x128xf32>
    %54 = vector.extract_strided_slice %53 {offsets = [0, 0], sizes = [16, 32], strides = [1, 1]} : vector<16x128xf32> to vector<16x32xf32>
    %55 = vector.extract_strided_slice %53 {offsets = [0, 32], sizes = [16, 32], strides = [1, 1]} : vector<16x128xf32> to vector<16x32xf32>
    %56 = vector.extract_strided_slice %53 {offsets = [0, 64], sizes = [16, 32], strides = [1, 1]} : vector<16x128xf32> to vector<16x32xf32>
    %57 = vector.extract_strided_slice %53 {offsets = [0, 96], sizes = [16, 32], strides = [1, 1]} : vector<16x128xf32> to vector<16x32xf32>
    %58 = arith.mulf %55, %43 : vector<16x32xf32>
    %59 = arith.mulf %54, %56 : vector<16x32xf32>
    %60 = arith.addf %58, %59 : vector<16x32xf32>
    %61 = math.tanh %60 : vector<16x32xf32>
    %62 = arith.mulf %57, %61 : vector<16x32xf32>
    %c32 = arith.constant 32 : index
    %c0_26 = arith.constant 0 : index
    %63 = vector.load %arg12[%c32, %c0_26] : memref<128x256xf32, #tpu.memory_space<vmem>>, vector<16x128xf32>
    %cst_27 = arith.constant dense<0.000000e+00> : vector<16x128xf32>
    %64 = tpu.matmul %62, %26, %cst_27 {dimension_numbers = #tpu.dot_dimension_numbers<[1], [0], [0], [1], [0, 0, 1, 1], [], []>} : vector<16x32xf32>, vector<32x128xf32>, vector<16x128xf32> -> vector<16x128xf32>
    %65 = arith.addf %63, %64 : vector<16x128xf32>
    %66 = math.tanh %65 : vector<16x128xf32>
    %67 = vector.broadcast %22 : vector<1x128xf32> to vector<16x128xf32>
    %68 = arith.mulf %66, %67 : vector<16x128xf32>
    %69 = vector.broadcast %25 : vector<1x128xf32> to vector<16x128xf32>
    %70 = arith.addf %68, %69 : vector<16x128xf32>
    %71 = vector.extract_strided_slice %70 {offsets = [0, 0], sizes = [16, 32], strides = [1, 1]} : vector<16x128xf32> to vector<16x32xf32>
    %72 = vector.extract_strided_slice %70 {offsets = [0, 32], sizes = [16, 32], strides = [1, 1]} : vector<16x128xf32> to vector<16x32xf32>
    %73 = vector.extract_strided_slice %70 {offsets = [0, 64], sizes = [16, 32], strides = [1, 1]} : vector<16x128xf32> to vector<16x32xf32>
    %74 = vector.extract_strided_slice %70 {offsets = [0, 96], sizes = [16, 32], strides = [1, 1]} : vector<16x128xf32> to vector<16x32xf32>
    %75 = arith.mulf %72, %60 : vector<16x32xf32>
    %76 = arith.mulf %71, %73 : vector<16x32xf32>
    %77 = arith.addf %75, %76 : vector<16x32xf32>
    %78 = math.tanh %77 : vector<16x32xf32>
    %79 = arith.mulf %74, %78 : vector<16x32xf32>
    %c48 = arith.constant 48 : index
    %c0_28 = arith.constant 0 : index
    %80 = vector.load %arg12[%c48, %c0_28] : memref<128x256xf32, #tpu.memory_space<vmem>>, vector<16x128xf32>
    %cst_29 = arith.constant dense<0.000000e+00> : vector<16x128xf32>
    %81 = tpu.matmul %79, %26, %cst_29 {dimension_numbers = #tpu.dot_dimension_numbers<[1], [0], [0], [1], [0, 0, 1, 1], [], []>} : vector<16x32xf32>, vector<32x128xf32>, vector<16x128xf32> -> vector<16x128xf32>
    %82 = arith.addf %80, %81 : vector<16x128xf32>
    %83 = math.tanh %82 : vector<16x128xf32>
    %84 = vector.broadcast %22 : vector<1x128xf32> to vector<16x128xf32>
    %85 = arith.mulf %83, %84 : vector<16x128xf32>
    %86 = vector.broadcast %25 : vector<1x128xf32> to vector<16x128xf32>
    %87 = arith.addf %85, %86 : vector<16x128xf32>
    %88 = vector.extract_strided_slice %87 {offsets = [0, 0], sizes = [16, 32], strides = [1, 1]} : vector<16x128xf32> to vector<16x32xf32>
    %89 = vector.extract_strided_slice %87 {offsets = [0, 32], sizes = [16, 32], strides = [1, 1]} : vector<16x128xf32> to vector<16x32xf32>
    %90 = vector.extract_strided_slice %87 {offsets = [0, 64], sizes = [16, 32], strides = [1, 1]} : vector<16x128xf32> to vector<16x32xf32>
    %91 = vector.extract_strided_slice %87 {offsets = [0, 96], sizes = [16, 32], strides = [1, 1]} : vector<16x128xf32> to vector<16x32xf32>
    %92 = arith.mulf %89, %77 : vector<16x32xf32>
    %93 = arith.mulf %88, %90 : vector<16x32xf32>
    %94 = arith.addf %92, %93 : vector<16x32xf32>
    %95 = math.tanh %94 : vector<16x32xf32>
    %96 = arith.mulf %91, %95 : vector<16x32xf32>
    %c64 = arith.constant 64 : index
    %c0_30 = arith.constant 0 : index
    %97 = vector.load %arg12[%c64, %c0_30] : memref<128x256xf32, #tpu.memory_space<vmem>>, vector<16x128xf32>
    %cst_31 = arith.constant dense<0.000000e+00> : vector<16x128xf32>
    %98 = tpu.matmul %96, %26, %cst_31 {dimension_numbers = #tpu.dot_dimension_numbers<[1], [0], [0], [1], [0, 0, 1, 1], [], []>} : vector<16x32xf32>, vector<32x128xf32>, vector<16x128xf32> -> vector<16x128xf32>
    %99 = arith.addf %97, %98 : vector<16x128xf32>
    %100 = math.tanh %99 : vector<16x128xf32>
    %101 = vector.broadcast %22 : vector<1x128xf32> to vector<16x128xf32>
    %102 = arith.mulf %100, %101 : vector<16x128xf32>
    %103 = vector.broadcast %25 : vector<1x128xf32> to vector<16x128xf32>
    %104 = arith.addf %102, %103 : vector<16x128xf32>
    %105 = vector.extract_strided_slice %104 {offsets = [0, 0], sizes = [16, 32], strides = [1, 1]} : vector<16x128xf32> to vector<16x32xf32>
    %106 = vector.extract_strided_slice %104 {offsets = [0, 32], sizes = [16, 32], strides = [1, 1]} : vector<16x128xf32> to vector<16x32xf32>
    %107 = vector.extract_strided_slice %104 {offsets = [0, 64], sizes = [16, 32], strides = [1, 1]} : vector<16x128xf32> to vector<16x32xf32>
    %108 = vector.extract_strided_slice %104 {offsets = [0, 96], sizes = [16, 32], strides = [1, 1]} : vector<16x128xf32> to vector<16x32xf32>
    %109 = arith.mulf %106, %94 : vector<16x32xf32>
    %110 = arith.mulf %105, %107 : vector<16x32xf32>
    %111 = arith.addf %109, %110 : vector<16x32xf32>
    %112 = math.tanh %111 : vector<16x32xf32>
    %113 = arith.mulf %108, %112 : vector<16x32xf32>
    %c80 = arith.constant 80 : index
    %c0_32 = arith.constant 0 : index
    %114 = vector.load %arg12[%c80, %c0_32] : memref<128x256xf32, #tpu.memory_space<vmem>>, vector<16x128xf32>
    %cst_33 = arith.constant dense<0.000000e+00> : vector<16x128xf32>
    %115 = tpu.matmul %113, %26, %cst_33 {dimension_numbers = #tpu.dot_dimension_numbers<[1], [0], [0], [1], [0, 0, 1, 1], [], []>} : vector<16x32xf32>, vector<32x128xf32>, vector<16x128xf32> -> vector<16x128xf32>
    %116 = arith.addf %114, %115 : vector<16x128xf32>
    %117 = math.tanh %116 : vector<16x128xf32>
    %118 = vector.broadcast %22 : vector<1x128xf32> to vector<16x128xf32>
    %119 = arith.mulf %117, %118 : vector<16x128xf32>
    %120 = vector.broadcast %25 : vector<1x128xf32> to vector<16x128xf32>
    %121 = arith.addf %119, %120 : vector<16x128xf32>
    %122 = vector.extract_strided_slice %121 {offsets = [0, 0], sizes = [16, 32], strides = [1, 1]} : vector<16x128xf32> to vector<16x32xf32>
    %123 = vector.extract_strided_slice %121 {offsets = [0, 32], sizes = [16, 32], strides = [1, 1]} : vector<16x128xf32> to vector<16x32xf32>
    %124 = vector.extract_strided_slice %121 {offsets = [0, 64], sizes = [16, 32], strides = [1, 1]} : vector<16x128xf32> to vector<16x32xf32>
    %125 = vector.extract_strided_slice %121 {offsets = [0, 96], sizes = [16, 32], strides = [1, 1]} : vector<16x128xf32> to vector<16x32xf32>
    %126 = arith.mulf %123, %111 : vector<16x32xf32>
    %127 = arith.mulf %122, %124 : vector<16x32xf32>
    %128 = arith.addf %126, %127 : vector<16x32xf32>
    %129 = math.tanh %128 : vector<16x32xf32>
    %130 = arith.mulf %125, %129 : vector<16x32xf32>
    %c96 = arith.constant 96 : index
    %c0_34 = arith.constant 0 : index
    %131 = vector.load %arg12[%c96, %c0_34] : memref<128x256xf32, #tpu.memory_space<vmem>>, vector<16x128xf32>
    %cst_35 = arith.constant dense<0.000000e+00> : vector<16x128xf32>
    %132 = tpu.matmul %130, %26, %cst_35 {dimension_numbers = #tpu.dot_dimension_numbers<[1], [0], [0], [1], [0, 0, 1, 1], [], []>} : vector<16x32xf32>, vector<32x128xf32>, vector<16x128xf32> -> vector<16x128xf32>
    %133 = arith.addf %131, %132 : vector<16x128xf32>
    %134 = math.tanh %133 : vector<16x128xf32>
    %135 = vector.broadcast %22 : vector<1x128xf32> to vector<16x128xf32>
    %136 = arith.mulf %134, %135 : vector<16x128xf32>
    %137 = vector.broadcast %25 : vector<1x128xf32> to vector<16x128xf32>
    %138 = arith.addf %136, %137 : vector<16x128xf32>
    %139 = vector.extract_strided_slice %138 {offsets = [0, 0], sizes = [16, 32], strides = [1, 1]} : vector<16x128xf32> to vector<16x32xf32>
    %140 = vector.extract_strided_slice %138 {offsets = [0, 32], sizes = [16, 32], strides = [1, 1]} : vector<16x128xf32> to vector<16x32xf32>
    %141 = vector.extract_strided_slice %138 {offsets = [0, 64], sizes = [16, 32], strides = [1, 1]} : vector<16x128xf32> to vector<16x32xf32>
    %142 = vector.extract_strided_slice %138 {offsets = [0, 96], sizes = [16, 32], strides = [1, 1]} : vector<16x128xf32> to vector<16x32xf32>
    %143 = arith.mulf %140, %128 : vector<16x32xf32>
    %144 = arith.mulf %139, %141 : vector<16x32xf32>
    %145 = arith.addf %143, %144 : vector<16x32xf32>
    %146 = math.tanh %145 : vector<16x32xf32>
    %147 = arith.mulf %142, %146 : vector<16x32xf32>
    %c112 = arith.constant 112 : index
    %c0_36 = arith.constant 0 : index
    %148 = vector.load %arg12[%c112, %c0_36] : memref<128x256xf32, #tpu.memory_space<vmem>>, vector<16x128xf32>
    %cst_37 = arith.constant dense<0.000000e+00> : vector<16x128xf32>
    %149 = tpu.matmul %147, %26, %cst_37 {dimension_numbers = #tpu.dot_dimension_numbers<[1], [0], [0], [1], [0, 0, 1, 1], [], []>} : vector<16x32xf32>, vector<32x128xf32>, vector<16x128xf32> -> vector<16x128xf32>
    %150 = arith.addf %148, %149 : vector<16x128xf32>
    %151 = math.tanh %150 : vector<16x128xf32>
    %152 = vector.broadcast %22 : vector<1x128xf32> to vector<16x128xf32>
    %153 = arith.mulf %151, %152 : vector<16x128xf32>
    %154 = vector.broadcast %25 : vector<1x128xf32> to vector<16x128xf32>
    %155 = arith.addf %153, %154 : vector<16x128xf32>
    %156 = vector.extract_strided_slice %155 {offsets = [0, 0], sizes = [16, 32], strides = [1, 1]} : vector<16x128xf32> to vector<16x32xf32>
    %157 = vector.extract_strided_slice %155 {offsets = [0, 32], sizes = [16, 32], strides = [1, 1]} : vector<16x128xf32> to vector<16x32xf32>
    %158 = vector.extract_strided_slice %155 {offsets = [0, 64], sizes = [16, 32], strides = [1, 1]} : vector<16x128xf32> to vector<16x32xf32>
    %159 = vector.extract_strided_slice %155 {offsets = [0, 96], sizes = [16, 32], strides = [1, 1]} : vector<16x128xf32> to vector<16x32xf32>
    %160 = arith.mulf %157, %145 : vector<16x32xf32>
    %161 = arith.mulf %156, %158 : vector<16x32xf32>
    %162 = arith.addf %160, %161 : vector<16x32xf32>
    %163 = math.tanh %162 : vector<16x32xf32>
    %164 = arith.mulf %159, %163 : vector<16x32xf32>
    %c0_38 = arith.constant 0 : index
    %c0_39 = arith.constant 0 : index
    %165 = vector.load %arg7[%c0_38, %c0_39] : memref<32x128xf32, #tpu.memory_space<vmem>>, vector<32x128xf32>
    %c0_40 = arith.constant 0 : index
    %c128 = arith.constant 128 : index
    %166 = vector.load %arg12[%c0_40, %c128] : memref<128x256xf32, #tpu.memory_space<vmem>>, vector<16x128xf32>
    %cst_41 = arith.constant dense<0.000000e+00> : vector<16x128xf32>
    %167 = tpu.matmul %164, %165, %cst_41 {dimension_numbers = #tpu.dot_dimension_numbers<[1], [0], [0], [1], [0, 0, 1, 1], [], []>} : vector<16x32xf32>, vector<32x128xf32>, vector<16x128xf32> -> vector<16x128xf32>
    %168 = arith.addf %166, %167 : vector<16x128xf32>
    %169 = math.tanh %168 : vector<16x128xf32>
    %170 = vector.broadcast %22 : vector<1x128xf32> to vector<16x128xf32>
    %171 = arith.mulf %169, %170 : vector<16x128xf32>
    %172 = vector.broadcast %25 : vector<1x128xf32> to vector<16x128xf32>
    %173 = arith.addf %171, %172 : vector<16x128xf32>
    %174 = vector.extract_strided_slice %173 {offsets = [0, 0], sizes = [16, 32], strides = [1, 1]} : vector<16x128xf32> to vector<16x32xf32>
    %175 = vector.extract_strided_slice %173 {offsets = [0, 32], sizes = [16, 32], strides = [1, 1]} : vector<16x128xf32> to vector<16x32xf32>
    %176 = vector.extract_strided_slice %173 {offsets = [0, 64], sizes = [16, 32], strides = [1, 1]} : vector<16x128xf32> to vector<16x32xf32>
    %177 = vector.extract_strided_slice %173 {offsets = [0, 96], sizes = [16, 32], strides = [1, 1]} : vector<16x128xf32> to vector<16x32xf32>
    %178 = arith.mulf %175, %162 : vector<16x32xf32>
    %179 = arith.mulf %174, %176 : vector<16x32xf32>
    %180 = arith.addf %178, %179 : vector<16x32xf32>
    %181 = math.tanh %180 : vector<16x32xf32>
    %182 = arith.mulf %177, %181 : vector<16x32xf32>
    %c0_42 = arith.constant 0 : index
    %c0_43 = arith.constant 0 : index
    %183 = vector.load %arg13[%c0_42, %c0_43] : memref<128x32xf32, #tpu.memory_space<vmem>>, vector<16x32xf32>
    tpu.vector_store %arg13[%c0_42, %c0_43], %182 {strides = array<i32>} : memref<128x32xf32, #tpu.memory_space<vmem>>, vector<16x32xf32>,
    %c16_44 = arith.constant 16 : index
    %c128_45 = arith.constant 128 : index
    %184 = vector.load %arg12[%c16_44, %c128_45] : memref<128x256xf32, #tpu.memory_space<vmem>>, vector<16x128xf32>
    %cst_46 = arith.constant dense<0.000000e+00> : vector<16x128xf32>
    %185 = tpu.matmul %182, %165, %cst_46 {dimension_numbers = #tpu.dot_dimension_numbers<[1], [0], [0], [1], [0, 0, 1, 1], [], []>} : vector<16x32xf32>, vector<32x128xf32>, vector<16x128xf32> -> vector<16x128xf32>
    %186 = arith.addf %184, %185 : vector<16x128xf32>
    %187 = math.tanh %186 : vector<16x128xf32>
    %188 = vector.broadcast %22 : vector<1x128xf32> to vector<16x128xf32>
    %189 = arith.mulf %187, %188 : vector<16x128xf32>
    %190 = vector.broadcast %25 : vector<1x128xf32> to vector<16x128xf32>
    %191 = arith.addf %189, %190 : vector<16x128xf32>
    %192 = vector.extract_strided_slice %191 {offsets = [0, 0], sizes = [16, 32], strides = [1, 1]} : vector<16x128xf32> to vector<16x32xf32>
    %193 = vector.extract_strided_slice %191 {offsets = [0, 32], sizes = [16, 32], strides = [1, 1]} : vector<16x128xf32> to vector<16x32xf32>
    %194 = vector.extract_strided_slice %191 {offsets = [0, 64], sizes = [16, 32], strides = [1, 1]} : vector<16x128xf32> to vector<16x32xf32>
    %195 = vector.extract_strided_slice %191 {offsets = [0, 96], sizes = [16, 32], strides = [1, 1]} : vector<16x128xf32> to vector<16x32xf32>
    %196 = arith.mulf %193, %180 : vector<16x32xf32>
    %197 = arith.mulf %192, %194 : vector<16x32xf32>
    %198 = arith.addf %196, %197 : vector<16x32xf32>
    %199 = math.tanh %198 : vector<16x32xf32>
    %200 = arith.mulf %195, %199 : vector<16x32xf32>
    %c16_47 = arith.constant 16 : index
    %c0_48 = arith.constant 0 : index
    %201 = vector.load %arg13[%c16_47, %c0_48] : memref<128x32xf32, #tpu.memory_space<vmem>>, vector<16x32xf32>
    tpu.vector_store %arg13[%c16_47, %c0_48], %200 {strides = array<i32>} : memref<128x32xf32, #tpu.memory_space<vmem>>, vector<16x32xf32>,
    %c32_49 = arith.constant 32 : index
    %c128_50 = arith.constant 128 : index
    %202 = vector.load %arg12[%c32_49, %c128_50] : memref<128x256xf32, #tpu.memory_space<vmem>>, vector<16x128xf32>
    %cst_51 = arith.constant dense<0.000000e+00> : vector<16x128xf32>
    %203 = tpu.matmul %200, %165, %cst_51 {dimension_numbers = #tpu.dot_dimension_numbers<[1], [0], [0], [1], [0, 0, 1, 1], [], []>} : vector<16x32xf32>, vector<32x128xf32>, vector<16x128xf32> -> vector<16x128xf32>
    %204 = arith.addf %202, %203 : vector<16x128xf32>
    %205 = math.tanh %204 : vector<16x128xf32>
    %206 = vector.broadcast %22 : vector<1x128xf32> to vector<16x128xf32>
    %207 = arith.mulf %205, %206 : vector<16x128xf32>
    %208 = vector.broadcast %25 : vector<1x128xf32> to vector<16x128xf32>
    %209 = arith.addf %207, %208 : vector<16x128xf32>
    %210 = vector.extract_strided_slice %209 {offsets = [0, 0], sizes = [16, 32], strides = [1, 1]} : vector<16x128xf32> to vector<16x32xf32>
    %211 = vector.extract_strided_slice %209 {offsets = [0, 32], sizes = [16, 32], strides = [1, 1]} : vector<16x128xf32> to vector<16x32xf32>
    %212 = vector.extract_strided_slice %209 {offsets = [0, 64], sizes = [16, 32], strides = [1, 1]} : vector<16x128xf32> to vector<16x32xf32>
    %213 = vector.extract_strided_slice %209 {offsets = [0, 96], sizes = [16, 32], strides = [1, 1]} : vector<16x128xf32> to vector<16x32xf32>
    %214 = arith.mulf %211, %198 : vector<16x32xf32>
    %215 = arith.mulf %210, %212 : vector<16x32xf32>
    %216 = arith.addf %214, %215 : vector<16x32xf32>
    %217 = math.tanh %216 : vector<16x32xf32>
    %218 = arith.mulf %213, %217 : vector<16x32xf32>
    %c32_52 = arith.constant 32 : index
    %c0_53 = arith.constant 0 : index
    %219 = vector.load %arg13[%c32_52, %c0_53] : memref<128x32xf32, #tpu.memory_space<vmem>>, vector<16x32xf32>
    tpu.vector_store %arg13[%c32_52, %c0_53], %218 {strides = array<i32>} : memref<128x32xf32, #tpu.memory_space<vmem>>, vector<16x32xf32>,
    %c48_54 = arith.constant 48 : index
    %c128_55 = arith.constant 128 : index
    %220 = vector.load %arg12[%c48_54, %c128_55] : memref<128x256xf32, #tpu.memory_space<vmem>>, vector<16x128xf32>
    %cst_56 = arith.constant dense<0.000000e+00> : vector<16x128xf32>
    %221 = tpu.matmul %218, %165, %cst_56 {dimension_numbers = #tpu.dot_dimension_numbers<[1], [0], [0], [1], [0, 0, 1, 1], [], []>} : vector<16x32xf32>, vector<32x128xf32>, vector<16x128xf32> -> vector<16x128xf32>
    %222 = arith.addf %220, %221 : vector<16x128xf32>
    %223 = math.tanh %222 : vector<16x128xf32>
    %224 = vector.broadcast %22 : vector<1x128xf32> to vector<16x128xf32>
    %225 = arith.mulf %223, %224 : vector<16x128xf32>
    %226 = vector.broadcast %25 : vector<1x128xf32> to vector<16x128xf32>
    %227 = arith.addf %225, %226 : vector<16x128xf32>
    %228 = vector.extract_strided_slice %227 {offsets = [0, 0], sizes = [16, 32], strides = [1, 1]} : vector<16x128xf32> to vector<16x32xf32>
    %229 = vector.extract_strided_slice %227 {offsets = [0, 32], sizes = [16, 32], strides = [1, 1]} : vector<16x128xf32> to vector<16x32xf32>
    %230 = vector.extract_strided_slice %227 {offsets = [0, 64], sizes = [16, 32], strides = [1, 1]} : vector<16x128xf32> to vector<16x32xf32>
    %231 = vector.extract_strided_slice %227 {offsets = [0, 96], sizes = [16, 32], strides = [1, 1]} : vector<16x128xf32> to vector<16x32xf32>
    %232 = arith.mulf %229, %216 : vector<16x32xf32>
    %233 = arith.mulf %228, %230 : vector<16x32xf32>
    %234 = arith.addf %232, %233 : vector<16x32xf32>
    %235 = math.tanh %234 : vector<16x32xf32>
    %236 = arith.mulf %231, %235 : vector<16x32xf32>
    %c48_57 = arith.constant 48 : index
    %c0_58 = arith.constant 0 : index
    %237 = vector.load %arg13[%c48_57, %c0_58] : memref<128x32xf32, #tpu.memory_space<vmem>>, vector<16x32xf32>
    tpu.vector_store %arg13[%c48_57, %c0_58], %236 {strides = array<i32>} : memref<128x32xf32, #tpu.memory_space<vmem>>, vector<16x32xf32>,
    %c64_59 = arith.constant 64 : index
    %c128_60 = arith.constant 128 : index
    %238 = vector.load %arg12[%c64_59, %c128_60] : memref<128x256xf32, #tpu.memory_space<vmem>>, vector<16x128xf32>
    %cst_61 = arith.constant dense<0.000000e+00> : vector<16x128xf32>
    %239 = tpu.matmul %236, %165, %cst_61 {dimension_numbers = #tpu.dot_dimension_numbers<[1], [0], [0], [1], [0, 0, 1, 1], [], []>} : vector<16x32xf32>, vector<32x128xf32>, vector<16x128xf32> -> vector<16x128xf32>
    %240 = arith.addf %238, %239 : vector<16x128xf32>
    %241 = math.tanh %240 : vector<16x128xf32>
    %242 = vector.broadcast %22 : vector<1x128xf32> to vector<16x128xf32>
    %243 = arith.mulf %241, %242 : vector<16x128xf32>
    %244 = vector.broadcast %25 : vector<1x128xf32> to vector<16x128xf32>
    %245 = arith.addf %243, %244 : vector<16x128xf32>
    %246 = vector.extract_strided_slice %245 {offsets = [0, 0], sizes = [16, 32], strides = [1, 1]} : vector<16x128xf32> to vector<16x32xf32>
    %247 = vector.extract_strided_slice %245 {offsets = [0, 32], sizes = [16, 32], strides = [1, 1]} : vector<16x128xf32> to vector<16x32xf32>
    %248 = vector.extract_strided_slice %245 {offsets = [0, 64], sizes = [16, 32], strides = [1, 1]} : vector<16x128xf32> to vector<16x32xf32>
    %249 = vector.extract_strided_slice %245 {offsets = [0, 96], sizes = [16, 32], strides = [1, 1]} : vector<16x128xf32> to vector<16x32xf32>
    %250 = arith.mulf %247, %234 : vector<16x32xf32>
    %251 = arith.mulf %246, %248 : vector<16x32xf32>
    %252 = arith.addf %250, %251 : vector<16x32xf32>
    %253 = math.tanh %252 : vector<16x32xf32>
    %254 = arith.mulf %249, %253 : vector<16x32xf32>
    %c64_62 = arith.constant 64 : index
    %c0_63 = arith.constant 0 : index
    %255 = vector.load %arg13[%c64_62, %c0_63] : memref<128x32xf32, #tpu.memory_space<vmem>>, vector<16x32xf32>
    tpu.vector_store %arg13[%c64_62, %c0_63], %254 {strides = array<i32>} : memref<128x32xf32, #tpu.memory_space<vmem>>, vector<16x32xf32>,
    %c80_64 = arith.constant 80 : index
    %c128_65 = arith.constant 128 : index
    %256 = vector.load %arg12[%c80_64, %c128_65] : memref<128x256xf32, #tpu.memory_space<vmem>>, vector<16x128xf32>
    %cst_66 = arith.constant dense<0.000000e+00> : vector<16x128xf32>
    %257 = tpu.matmul %254, %165, %cst_66 {dimension_numbers = #tpu.dot_dimension_numbers<[1], [0], [0], [1], [0, 0, 1, 1], [], []>} : vector<16x32xf32>, vector<32x128xf32>, vector<16x128xf32> -> vector<16x128xf32>
    %258 = arith.addf %256, %257 : vector<16x128xf32>
    %259 = math.tanh %258 : vector<16x128xf32>
    %260 = vector.broadcast %22 : vector<1x128xf32> to vector<16x128xf32>
    %261 = arith.mulf %259, %260 : vector<16x128xf32>
    %262 = vector.broadcast %25 : vector<1x128xf32> to vector<16x128xf32>
    %263 = arith.addf %261, %262 : vector<16x128xf32>
    %264 = vector.extract_strided_slice %263 {offsets = [0, 0], sizes = [16, 32], strides = [1, 1]} : vector<16x128xf32> to vector<16x32xf32>
    %265 = vector.extract_strided_slice %263 {offsets = [0, 32], sizes = [16, 32], strides = [1, 1]} : vector<16x128xf32> to vector<16x32xf32>
    %266 = vector.extract_strided_slice %263 {offsets = [0, 64], sizes = [16, 32], strides = [1, 1]} : vector<16x128xf32> to vector<16x32xf32>
    %267 = vector.extract_strided_slice %263 {offsets = [0, 96], sizes = [16, 32], strides = [1, 1]} : vector<16x128xf32> to vector<16x32xf32>
    %268 = arith.mulf %265, %252 : vector<16x32xf32>
    %269 = arith.mulf %264, %266 : vector<16x32xf32>
    %270 = arith.addf %268, %269 : vector<16x32xf32>
    %271 = math.tanh %270 : vector<16x32xf32>
    %272 = arith.mulf %267, %271 : vector<16x32xf32>
    %c80_67 = arith.constant 80 : index
    %c0_68 = arith.constant 0 : index
    %273 = vector.load %arg13[%c80_67, %c0_68] : memref<128x32xf32, #tpu.memory_space<vmem>>, vector<16x32xf32>
    tpu.vector_store %arg13[%c80_67, %c0_68], %272 {strides = array<i32>} : memref<128x32xf32, #tpu.memory_space<vmem>>, vector<16x32xf32>,
    %c96_69 = arith.constant 96 : index
    %c128_70 = arith.constant 128 : index
    %274 = vector.load %arg12[%c96_69, %c128_70] : memref<128x256xf32, #tpu.memory_space<vmem>>, vector<16x128xf32>
    %cst_71 = arith.constant dense<0.000000e+00> : vector<16x128xf32>
    %275 = tpu.matmul %272, %165, %cst_71 {dimension_numbers = #tpu.dot_dimension_numbers<[1], [0], [0], [1], [0, 0, 1, 1], [], []>} : vector<16x32xf32>, vector<32x128xf32>, vector<16x128xf32> -> vector<16x128xf32>
    %276 = arith.addf %274, %275 : vector<16x128xf32>
    %277 = math.tanh %276 : vector<16x128xf32>
    %278 = vector.broadcast %22 : vector<1x128xf32> to vector<16x128xf32>
    %279 = arith.mulf %277, %278 : vector<16x128xf32>
    %280 = vector.broadcast %25 : vector<1x128xf32> to vector<16x128xf32>
    %281 = arith.addf %279, %280 : vector<16x128xf32>
    %282 = vector.extract_strided_slice %281 {offsets = [0, 0], sizes = [16, 32], strides = [1, 1]} : vector<16x128xf32> to vector<16x32xf32>
    %283 = vector.extract_strided_slice %281 {offsets = [0, 32], sizes = [16, 32], strides = [1, 1]} : vector<16x128xf32> to vector<16x32xf32>
    %284 = vector.extract_strided_slice %281 {offsets = [0, 64], sizes = [16, 32], strides = [1, 1]} : vector<16x128xf32> to vector<16x32xf32>
    %285 = vector.extract_strided_slice %281 {offsets = [0, 96], sizes = [16, 32], strides = [1, 1]} : vector<16x128xf32> to vector<16x32xf32>
    %286 = arith.mulf %283, %270 : vector<16x32xf32>
    %287 = arith.mulf %282, %284 : vector<16x32xf32>
    %288 = arith.addf %286, %287 : vector<16x32xf32>
    %289 = math.tanh %288 : vector<16x32xf32>
    %290 = arith.mulf %285, %289 : vector<16x32xf32>
    %c96_72 = arith.constant 96 : index
    %c0_73 = arith.constant 0 : index
    %291 = vector.load %arg13[%c96_72, %c0_73] : memref<128x32xf32, #tpu.memory_space<vmem>>, vector<16x32xf32>
    tpu.vector_store %arg13[%c96_72, %c0_73], %290 {strides = array<i32>} : memref<128x32xf32, #tpu.memory_space<vmem>>, vector<16x32xf32>,
    %c112_74 = arith.constant 112 : index
    %c128_75 = arith.constant 128 : index
    %292 = vector.load %arg12[%c112_74, %c128_75] : memref<128x256xf32, #tpu.memory_space<vmem>>, vector<16x128xf32>
    %cst_76 = arith.constant dense<0.000000e+00> : vector<16x128xf32>
    %293 = tpu.matmul %290, %165, %cst_76 {dimension_numbers = #tpu.dot_dimension_numbers<[1], [0], [0], [1], [0, 0, 1, 1], [], []>} : vector<16x32xf32>, vector<32x128xf32>, vector<16x128xf32> -> vector<16x128xf32>
    %294 = arith.addf %292, %293 : vector<16x128xf32>
    %295 = math.tanh %294 : vector<16x128xf32>
    %296 = vector.broadcast %22 : vector<1x128xf32> to vector<16x128xf32>
    %297 = arith.mulf %295, %296 : vector<16x128xf32>
    %298 = vector.broadcast %25 : vector<1x128xf32> to vector<16x128xf32>
    %299 = arith.addf %297, %298 : vector<16x128xf32>
    %300 = vector.extract_strided_slice %299 {offsets = [0, 0], sizes = [16, 32], strides = [1, 1]} : vector<16x128xf32> to vector<16x32xf32>
    %301 = vector.extract_strided_slice %299 {offsets = [0, 32], sizes = [16, 32], strides = [1, 1]} : vector<16x128xf32> to vector<16x32xf32>
    %302 = vector.extract_strided_slice %299 {offsets = [0, 64], sizes = [16, 32], strides = [1, 1]} : vector<16x128xf32> to vector<16x32xf32>
    %303 = vector.extract_strided_slice %299 {offsets = [0, 96], sizes = [16, 32], strides = [1, 1]} : vector<16x128xf32> to vector<16x32xf32>
    %304 = arith.mulf %301, %288 : vector<16x32xf32>
    %305 = arith.mulf %300, %302 : vector<16x32xf32>
    %306 = arith.addf %304, %305 : vector<16x32xf32>
    %307 = math.tanh %306 : vector<16x32xf32>
    %308 = arith.mulf %303, %307 : vector<16x32xf32>
    %c112_77 = arith.constant 112 : index
    %c0_78 = arith.constant 0 : index
    %309 = vector.load %arg13[%c112_77, %c0_78] : memref<128x32xf32, #tpu.memory_space<vmem>>, vector<16x32xf32>
    tpu.vector_store %arg13[%c112_77, %c0_78], %308 {strides = array<i32>} : memref<128x32xf32, #tpu.memory_space<vmem>>, vector<16x32xf32>,
    %c0_79 = arith.constant 0 : index
    %c0_80 = arith.constant 0 : index
    %310 = vector.load %arg13[%c0_79, %c0_80] : memref<128x32xf32, #tpu.memory_space<vmem>>, vector<128x32xf32>
    %c0_81 = arith.constant 0 : index
    %c0_82 = arith.constant 0 : index
    %311 = vector.load %arg8[%c0_81, %c0_82] : memref<32x2xf32, #tpu.memory_space<vmem>>, vector<32x2xf32>
    %cst_83 = arith.constant dense<0.000000e+00> : vector<128x2xf32>
    %312 = tpu.matmul %310, %311, %cst_83 {dimension_numbers = #tpu.dot_dimension_numbers<[1], [0], [0], [1], [0, 0, 1, 1], [], []>} : vector<128x32xf32>, vector<32x2xf32>, vector<128x2xf32> -> vector<128x2xf32>
    %c0_84 = arith.constant 0 : index
    %c0_85 = arith.constant 0 : index
    %313 = vector.load %arg9[%c0_84, %c0_85] : memref<1x2xf32, #tpu.memory_space<vmem>>, vector<1x2xf32>
    %314 = vector.broadcast %313 : vector<1x2xf32> to vector<128x2xf32>
    %315 = arith.addf %312, %314 : vector<128x2xf32>
    %c0_86 = arith.constant 0 : index
    %c0_87 = arith.constant 0 : index
    %316 = vector.load %arg10[%c0_86, %c0_87] : memref<128x2xf32, #tpu.memory_space<vmem>>, vector<128x2xf32>
    tpu.vector_store %arg10[%c0_86, %c0_87], %315 {strides = array<i32>} : memref<128x2xf32, #tpu.memory_space<vmem>>, vector<128x2xf32>,
    %c0_88 = arith.constant 0 : index
    %c0_89 = arith.constant 0 : index
    %317 = vector.load %arg1[%c0_88, %c0_89] : memref<128x2xf32, #tpu.memory_space<vmem>>, vector<128x2xf32>
    %318 = arith.subf %315, %317 : vector<128x2xf32>
    %319 = arith.mulf %318, %318 : vector<128x2xf32>
    %cst_90 = arith.constant dense<0.000000e+00> : vector<128xf32>
    %320 = vector.multi_reduction <add>, %319, %cst_90 [1] : vector<128x2xf32> to vector<128xf32>
    %321 = vector.shape_cast %320 : vector<128xf32> to vector<128x1xf32>
    %322 = math.sqrt %321 : vector<128x1xf32>
    %323 = vector.shape_cast %322 : vector<128x1xf32> to vector<1x128x1xf32>
    %cst_91 = arith.constant dense<0.000000e+00> : vector<1xf32>
    %324 = vector.multi_reduction <add>, %323, %cst_91 [1, 2] : vector<1x128x1xf32> to vector<1xf32>
    %325 = vector.shape_cast %324 : vector<1xf32> to vector<1x1x1xf32>
    %326 = vector.extract %325[0, 0, 0] : f32 from vector<1x1x1xf32>
    %cst_92 = arith.constant 6.250000e-02 : f32
    %327 = arith.mulf %326, %cst_92 : f32
    %c0_93 = arith.constant 0 : index
    %328 = memref.load %arg11[%c0_93] : memref<1xf32, #tpu.memory_space<smem>>
    memref.store %327, %arg11[%c0_93] : memref<1xf32, #tpu.memory_space<smem>>
    return
  }
}

</mosaic_0001>

<bundles_post_ra>
// kernel: seq2seq_forward.1
= control target key start
LH: loop header
LB: loop body
LE: loop exit
PB: predicated region body
PF: predicated region fallthrough
CT: control target
= control target key end

     0   :  { %vm111_vm0 = vcmask 1043456   ;;  %vm62_vm1 = vcmask 31744   ;;  %s4934_s0 = inlined_call_operand.vmem [shape: f32[128,4], index: 0, kind: input, shape index: {}]   ;;  %s4935_s1 = inlined_call_operand.vmem [shape: f32[128,2], index: 1, kind: input, shape index: {}]   ;;  %s4936_s2 = inlined_call_operand.vmem [shape: f32[4,32], index: 2, kind: input, shape index: {}]   ;;  %s4937_s3 = inlined_call_operand.vmem [shape: f32[1,32], index: 3, kind: input, shape index: {}]   ;;  %s4938_s4 = inlined_call_operand.vmem [shape: f32[32,256], index: 4, kind: input, shape index: {}]   ;;  %s4939_s5 = inlined_call_operand.vmem [shape: f32[1,256], index: 5, kind: input, shape index: {}]   ;;  %s4940_s6 = inlined_call_operand.vmem [shape: f32[32,128], index: 6, kind: input, shape index: {}]   ;;  %s4941_s7 = inlined_call_operand.vmem [shape: f32[32,128], index: 7, kind: input, shape index: {}]   ;;  %s4942_s8 = inlined_call_operand.vmem [shape: f32[32,2], index: 8, kind: input, shape index: {}]   ;;  %s4943_s9 = inlined_call_operand.vmem [shape: f32[1,2], index: 9, kind: input, shape index: {}]   ;;  %s4944_s10 = inlined_call_operand.vmem [shape: f32[128,2], index: 10, kind: output, shape index: {0}]   ;;  %s4945_s11 = inlined_call_operand.hbm [shape: f32[1], index: 11, kind: output, shape index: {1}]  }
   0x1   :  { %v54_v0 = vld [vmem:[%s4936_s2] sm:$0xf]  ;;  %v39_v2 = vld [vmem:[%s4934_s0 + $0x8] sm:$0xff]  ;;  %v40_v3 = vld [vmem:[%s4934_s0 + $0x10] sm:$0xff] }
   0x2   :  { %v38_v1 = vld [vmem:[%s4934_s0] sm:$0xff]  ;;  %3368 = vmatprep.subr.msk.mxu0 %vm111_vm0, %v54_v0  ;;  %3746 = vmatprep.subr.msk.mxu1 %vm111_vm0, %v54_v0  ;;  %v47_v5 = vld [vmem:[%s4934_s0 + $0x48] sm:$0xff]  ;;  %v48_v6 = vld [vmem:[%s4934_s0 + $0x50] sm:$0xff] }
   0x3   :  { %3370 = vmatprep.mubr.msk.f32.mxu0 %vm62_vm1, %v38_v1  ;;  %3369 = vmatpush3.msk.msra.mxu0 %vm111_vm0, %v54_v0  ;;  %v46_v4 = vld [vmem:[%s4934_s0 + $0x40] sm:$0xff]  ;;  %v41_v7 = vld [vmem:[%s4934_s0 + $0x18] sm:$0xff]  ;;  %v277_v10 = vld [vmem:[%s4938_s4 + $0x8] sm:$0xff] }
   0x4   :  { %3371 = vmatmul.mubr.msk.f32.vlgmr.msra.gmra.mrb[0].mxu0 %vm62_vm1, %v39_v2  ;;  %3747 = vmatpush3.msk.msra.mxu1 %vm111_vm0, %v54_v0  ;;  %v42_v8 = vld [vmem:[%s4934_s0 + $0x20] sm:$0xff]  ;;  %v49_v9 = vld [vmem:[%s4934_s0 + $0x58] sm:$0xff]  ;;  %v43_v13 = vld [vmem:[%s4934_s0 + $0x28] sm:$0xff] }
   0x5   :  { %3373 = vmatprep.mubr.msk.f32.mxu0 %vm62_vm1, %v40_v3  ;;  %3382 = vmatprep.mubr.msk.f32.mxu1 %vm62_vm1, %v46_v4  ;;  %v279_v11 = vld [vmem:[%s4938_s4 + $0x18] sm:$0xff]  ;;  %v276_v12 = vld [vmem:[%s4938_s4] sm:$0xff]  ;;  %v278_v15 = vld [vmem:[%s4938_s4 + $0x10] sm:$0xff] }
   0x6   :  { %3383 = vmatmul.mubr.msk.f32.vlgmr.msra.gmra.mrb[0].mxu1 %vm62_vm1, %v47_v5  ;;  %v3602_v14 = vpack.c.bf16 %v279_v11, %v277_v10  ;;  %v545_v16 = vld [vmem:[%s4940_s6] sm:$0xff]  ;;  %v546_v17 = vld [vmem:[%s4940_s6 + $0x8] sm:$0xff]  ;;  %v44_v18 = vld [vmem:[%s4934_s0 + $0x30] sm:$0xff]  ;;  %v3604_v20 = vpack.c.bf16 %v278_v15, %v276_v12 }
   0x7   :  { %3385 = vmatprep.mubr.msk.f32.mxu1 %vm62_vm1, %v48_v6  ;;  %v50_v19 = vld [vmem:[%s4934_s0 + $0x60] sm:$0xff]  ;;  %v4056_v21 = vpack.c.bf16 %v546_v17, %v545_v16  ;;  %v281_v22 = vld [vmem:[%s4938_s4 + $0x28] sm:$0xff]  ;;  %v283_v23 = vld [vmem:[%s4938_s4 + $0x38] sm:$0xff] }
   0x8   :  { %3374 = vmatmul.mubr.msk.f32.gmra.mrb[2].mxu0 %vm62_vm1, %v41_v7  ;;  %3603 = vmatprep.subr.bf16.mxu1 %v3602_v14  ;;  %v280_v24 = vld [vmem:[%s4938_s4 + $0x20] sm:$0xff]  ;;  %v282_v25 = vld [vmem:[%s4938_s4 + $0x30] sm:$0xff]  ;;  %v3606_v26 = vpack.c.bf16 %v283_v23, %v281_v22  ;;  %v548_v28 = vld [vmem:[%s4940_s6 + $0x18] sm:$0xff] }
   0x9   :  { %3376 = vmatprep.mubr.msk.f32.mxu0 %vm62_vm1, %v42_v8  ;;  %3611 = vmatprep.subr.bf16.mxu0 %v4056_v21  ;;  %v547_v27 = vld [vmem:[%s4940_s6 + $0x10] sm:$0xff] }
   0xa   :  { %3386 = vmatmul.mubr.msk.f32.gmra.mrb[2].mxu1 %vm62_vm1, %v49_v9 }
   0xb   :  { %17 = vsyncpa [#allocation5], 0  ;;  %3388 = vmatprep.mubr.msk.f32.mxu1 %vm62_vm1, %v50_v19  ;;  %v51_v29 = vld [vmem:[%s4934_s0 + $0x68] sm:$0xff]  ;;  %3605 = vmatpush1.bf16.msra.mxu1 %v3604_v20  ;;  %v3608_v30 = vpack.c.bf16 %v282_v25, %v280_v24  ;;  %v4083_v31 = vpack.c.bf16 %v548_v28, %v547_v27  ;;  %v52_v32 = vld [vmem:[%s4934_s0 + $0x70] sm:$0xff]  ;;  %v3927_v35 = vmov 0.0   ;;  %vm296_vm2 = vcmask 261120  }
   0xc   :  { %3377 = vmatmul.mubr.msk.f32.gmra.mrb[4].mxu0 %vm62_vm1, %v43_v13  ;;  %3607 = vmatprep.subr.bf16.mxu1 %v3606_v26  ;;  %v45_v33 = vld [vmem:[%s4934_s0 + $0x38] sm:$0xff]  ;;  %v4115_v36 = vld [vmem:[%s4937_s3] ss:$0 sm:$0xff]  ;;  %v286_v24 = vlaneseq  ;;  %s3930_s15 = smov 32   ;;  %vm2868_vm6 = vcmask 15360   ;;  %vm3093_vm11 = vcmask 7168  }
   0xd   :  { %3379 = vmatprep.mubr.msk.f32.mxu0 %vm62_vm1, %v44_v18  ;;  %3613 = vmatpush3.bf16.msra.mxu0 %v4056_v21  ;;  %v53_v34 = vld [vmem:[%s4934_s0 + $0x78] sm:$0xff]  ;;  %v284_v27 = vld [vmem:[%s4939_s5] sm:$0x3]  ;;  %s3929_s5 = smov 64   ;;  %s3915_s18 = scalar_lea.hbm %s4945_s11, 16 }
   0xe   :  { %3389 = vmatmul.mubr.msk.f32.gmra.mrb[4].mxu1 %vm62_vm1, %v51_v29  ;;  %3615 = vmatprep.subr.bf16.mxu0 %v4083_v31  ;;  %v287_v25 = vshrl.u32 %v286_v24, 7  ;;  %p3916_p0 = scmp.ne.s32.totalorder %s4945_s11, %s3915_s18  ;;  %p3919_p1 = scmp.lt.u32.totalorder %s3915_s18, %s4945_s11 }
   0xf   :  { %3391 = vmatprep.mubr.msk.f32.mxu1 %vm62_vm1, %v52_v32  ;;  %3609 = vmatpush1.bf16.msra.mxu1 %v3608_v30 }
  0x10   :  { %3380 = vmatmul.mubr.msk.f32.gmra.mrb[6].mxu0 %vm62_vm1, %v45_v33  ;;  %3651 = vmatprep.subr.bf16.mxu1 %v4056_v21  ;;  %v288_v26 = vsub.s32 0, %v287_v25  ;;  %v539_v33 = vand.u32 127, %v286_v24  ;;  %p3921_p2 = pnand %p3919_p1, %p3916_p0 }
  0x11   :  { %3617 = vmatpush3.bf16.msra.mxu0 %v4083_v31  ;;  %3402 = vmatprep.mubr.f32.mxu0 %v3927_v35 }
  0x12   :  { %3392 = vmatmul.mubr.msk.f32.gmra.mrb[6].mxu1 %vm62_vm1, %v53_v34  ;;  %3619 = vmatprep.subr.bf16.mxu0 %v4056_v21  ;;  %v4171_v28 = vrot.slane %v284_v27, %v288_v26  ;;  %vm540_vm3 = vcmp.ge.s32.totalorder %v539_v33, 64  ;;  %vm541_vm4 = vcmp.lt.s32.totalorder %v539_v33, 96 }
  0x13   :  { %409 = vmatprep.mubr.f32.mxu1 %v3927_v35  ;;  %vm542_vm5 = vmand %vm540_vm3, %vm541_vm4 }
  0x14   :  { %3403 = vmatmul.mubr.f32.vlgmr.msra.gmra.mrb[8].mxu0 %v3927_v35 }
  0x15   :  { %3621 = vmatpush3.bf16.msra.mxu0 %v4056_v21 }
  0x16   :  { %3623 = vmatprep.subr.bf16.mxu0 %v4083_v31 }
  0x19   :  { %3625 = vmatpush3.bf16.msra.mxu0 %v4083_v31 }
  0x1a   :  { %3627 = vmatprep.subr.bf16.mxu0 %v4056_v21 }
  0xd7   :  { %v3372_v37 = vpop.f32.mrb[0].mxu0 }
  0xd8   :  { %v181_v38 = vpop.f32.mrb[1].mxu0  ;;  %v187_v42 = vadd.f32 %v3372_v37, %v4115_v36 }
  0xd9   :  { %v182_v39 = vadd.f32 %v4115_v36, %v181_v38  ;;  %v3384_v40 = vpop.f32.mrb[0].mxu1 }
  0xda   :  { %v221_v41 = vpop.f32.mrb[1].mxu1  ;;  %v261_v49 = vmax.f32 %v187_v42, 0.0  ;;  %v227_v6 = vadd.f32 %v3384_v40, %v4115_v36 }
  0xdb   :  { %v260_v43 = vmax.f32 %v182_v39, 0.0  ;;  %v3375_v44 = vpop.f32.mrb[2].mxu0  ;;  %v222_v5 = vadd.f32 %v4115_v36, %v221_v41  ;;  %v292_v39 = vsub.s32 1, %v287_v25  ;;  %v3928_v41 = vmov 0.5  }
  0xdc   :  { %v191_v45 = vpop.f32.mrb[3].mxu0  ;;  %v197_v52 = vadd.f32 %v3375_v44, %v4115_v36  ;;  %v269_v8 = vmax.f32 %v227_v6, 0.0  ;;  %v4181_v42 = vsel %vm542_vm5, 1.0, %v3928_v41 }
  0xdd   :  { %3172 = vmatmul.mubr.msk.f32.vlgmr.msra.gmra.mrb[8].mxu1 %vm296_vm2, %v260_v43  ;;  %v192_v46 = vadd.f32 %v4115_v36, %v191_v45  ;;  %v3387_v47 = vpop.f32.mrb[2].mxu1  ;;  %v268_v7 = vmax.f32 %v222_v5, 0.0  ;;  %v4179_v40 = vrot.slane %v284_v27, %v292_v39 }
  0xde   :  { %415 = vmatprep.mubr.f32.mxu1 %v3927_v35  ;;  %v231_v48 = vpop.f32.mrb[3].mxu1  ;;  %3653 = vmatpush3.bf16.msra.mxu1 %v4056_v21  ;;  %v263_v58 = vmax.f32 %v197_v52, 0.0  ;;  %v237_v10 = vadd.f32 %v3387_v47, %v4115_v36  ;;  %v4186_v47 = vsel %vm542_vm5, 0.0, %v3928_v41 }
  0xdf   :  { %v3378_v50 = vpop.f32.mrb[4].mxu0  ;;  %3655 = vmatprep.subr.bf16.mxu1 %v4083_v31  ;;  %v262_v53 = vmax.f32 %v192_v46, 0.0  ;;  %v232_v9 = vadd.f32 %v4115_v36, %v231_v48 }
  0xe0   :  { %v201_v51 = vpop.f32.mrb[5].mxu0  ;;  %v207_v62 = vadd.f32 %v3378_v50, %v4115_v36  ;;  %v271_v12 = vmax.f32 %v237_v10, 0.0 }
  0xe1   :  { %3173 = vmatmul.mubr.msk.f32.gmra.mrb[10].mxu1 %vm296_vm2, %v261_v49  ;;  %v3390_v54 = vpop.f32.mrb[4].mxu1  ;;  %v202_v59 = vadd.f32 %v4115_v36, %v201_v51  ;;  %v270_v11 = vmax.f32 %v232_v9, 0.0 }
  0xe2   :  { %421 = vmatprep.mubr.f32.mxu1 %v3927_v35  ;;  %v241_v55 = vpop.f32.mrb[5].mxu1  ;;  %3657 = vmatpush3.bf16.msra.mxu1 %v4083_v31  ;;  %v265_v0 = vmax.f32 %v207_v62, 0.0  ;;  %v247_v14 = vadd.f32 %v3390_v54, %v4115_v36 }
  0xe3   :  { %v3381_v56 = vpop.f32.mrb[6].mxu0  ;;  %3667 = vmatprep.subr.bf16.mxu1 %v4056_v21  ;;  %v264_v63 = vmax.f32 %v202_v59, 0.0  ;;  %v242_v13 = vadd.f32 %v4115_v36, %v241_v55 }
  0xe4   :  { %v211_v57 = vpop.f32.mrb[7].mxu0  ;;  %v217_v2 = vadd.f32 %v3381_v56, %v4115_v36  ;;  %v273_v16 = vmax.f32 %v247_v14, 0.0 }
  0xe5   :  { %3174 = vmatmul.mubr.msk.f32.gmra.mrb[12].mxu1 %vm296_vm2, %v262_v53  ;;  %v3393_v60 = vpop.f32.mrb[6].mxu1  ;;  %v212_v1 = vadd.f32 %v4115_v36, %v211_v57  ;;  %v272_v15 = vmax.f32 %v242_v13, 0.0 }
  0xe6   :  { %427 = vmatprep.mubr.f32.mxu1 %v3927_v35  ;;  %v251_v61 = vpop.f32.mrb[7].mxu1  ;;  %v267_v4 = vmax.f32 %v217_v2, 0.0  ;;  %v257_v18 = vadd.f32 %v3393_v60, %v4115_v36 }
  0xe7   :  { %v266_v3 = vmax.f32 %v212_v1, 0.0  ;;  %v252_v17 = vadd.f32 %v4115_v36, %v251_v61  ;;  %v3404_v22 = vpop.f32.mrb[8].mxu0 }
  0xe8   :  { %v275_v20 = vmax.f32 %v257_v18, 0.0  ;;  %v620_v23 = vpop.f32.mrb[9].mxu0 }
  0xe9   :  { %3175 = vmatmul.mubr.msk.f32.gmra.mrb[14].mxu1 %vm296_vm2, %v263_v58  ;;  %v274_v19 = vmax.f32 %v252_v17, 0.0 }
  0xea   :  { %433 = vmatprep.mubr.f32.mxu1 %v3927_v35 }
  0xed   :  { %3176 = vmatmul.mubr.msk.f32.gmra.mrb[16].mxu1 %vm296_vm2, %v264_v63 }
  0xee   :  { %439 = vmatprep.mubr.f32.mxu1 %v3927_v35 }
  0xf1   :  { %3177 = vmatmul.mubr.msk.f32.gmra.mrb[18].mxu1 %vm296_vm2, %v265_v0 }
  0xf2   :  { %445 = vmatprep.mubr.f32.mxu1 %v3927_v35 }
  0xf5   :  { %3178 = vmatmul.mubr.msk.f32.gmra.mrb[20].mxu1 %vm296_vm2, %v266_v3 }
  0xf6   :  { %451 = vmatprep.mubr.f32.mxu1 %v3927_v35 }
  0xf9   :  { %3179 = vmatmul.mubr.msk.f32.gmra.mrb[22].mxu1 %vm296_vm2, %v267_v4 }
  0xfa   :  { %457 = vmatprep.mubr.f32.mxu1 %v3927_v35 }
  0xfd   :  { %3180 = vmatmul.mubr.msk.f32.gmra.mrb[24].mxu1 %vm296_vm2, %v268_v7 }
  0xfe   :  { %463 = vmatprep.mubr.f32.mxu1 %v3927_v35 }
 0x101   :  { %3181 = vmatmul.mubr.msk.f32.gmra.mrb[26].mxu1 %vm296_vm2, %v269_v8 }
 0x102   :  { %469 = vmatprep.mubr.f32.mxu1 %v3927_v35 }
 0x105   :  { %3182 = vmatmul.mubr.msk.f32.gmra.mrb[28].mxu1 %vm296_vm2, %v270_v11 }
 0x106   :  { %475 = vmatprep.mubr.f32.mxu1 %v3927_v35 }
 0x109   :  { %3183 = vmatmul.mubr.msk.f32.gmra.mrb[30].mxu1 %vm296_vm2, %v271_v12 }
 0x10a   :  { %481 = vmatprep.mubr.f32.mxu1 %v3927_v35 }
 0x10d   :  { %3184 = vmatmul.mubr.msk.f32.gmra.mrb[32].mxu1 %vm296_vm2, %v272_v15 }
 0x10e   :  { %487 = vmatprep.mubr.f32.mxu1 %v3927_v35 }
 0x111   :  { %3185 = vmatmul.mubr.msk.f32.gmra.mrb[34].mxu1 %vm296_vm2, %v273_v16 }
 0x112   :  { %493 = vmatprep.mubr.f32.mxu1 %v3927_v35 }
 0x115   :  { %3186 = vmatmul.mubr.msk.f32.gmra.mrb[36].mxu1 %vm296_vm2, %v274_v19 }
 0x116   :  { %499 = vmatprep.mubr.f32.mxu1 %v3927_v35 }
 0x119   :  { %3187 = vmatmul.mubr.msk.f32.gmra.mrb[38].mxu1 %vm296_vm2, %v275_v20 }
 0x1b0   :  { %v411_v29 = vpop.f32.mrb[8].mxu1 }
 0x1b1   :  { %v412_v30 = vadd.f32 %v411_v29, %v4171_v28  ;;  %v4174_v32 = vpop.f32.mrb[9].mxu1 }
 0x1b3   :  { %v629_v34 = vadd.f32 %v620_v23, %v412_v30 }
 0x1b4   :  { %v417_v35 = vpop.f32.mrb[10].mxu1 }
 0x1b5   :  { %3755 = vtanh.f32 %v629_v34  ;;  %v418_v36 = vadd.f32 %v417_v35, %v4171_v28  ;;  %v4177_v37 = vpop.f32.mrb[11].mxu1 }
 0x1b7   :  { %v630_v38 = vadd.f32 %v3404_v22, %v418_v36 }
 0x1b8   :  { %v423_v43 = vpop.f32.mrb[12].mxu1 }
 0x1b9   :  { %3757 = vtanh.f32 %v630_v38  ;;  %v4184_v44 = vadd.f32 %v423_v43, %v4171_v28  ;;  %v425_v45 = vpop.f32.mrb[13].mxu1 }
 0x1ba   :  { %v4189_v48 = vadd.f32 %v425_v45, %v4179_v40 }
 0x1bc   :  { %v429_v49 = vpop.f32.mrb[14].mxu1 }
 0x1bd   :  { %v4193_v51 = vadd.f32 %v429_v49, %v4171_v28  ;;  %v431_v52 = vpop.f32.mrb[15].mxu1 }
 0x1be   :  { %v4196_v53 = vadd.f32 %v431_v52, %v4179_v40 }
 0x1bf   :  { %v3756_v46 = vpop.eup %3755 }
 0x1c0   :  { %v633_v50 = vmul.f32 %v3756_v46, %v4181_v42  ;;  %v435_v54 = vpop.f32.mrb[16].mxu1 }
 0x1c1   :  { %v4202_v56 = vadd.f32 %v435_v54, %v4171_v28  ;;  %v437_v57 = vpop.f32.mrb[17].mxu1 }
 0x1c2   :  { %v4199_v55 = vadd.f32 %v633_v50, %v4186_v47  ;;  %v4205_v59 = vadd.f32 %v437_v57, %v4179_v40 }
 0x1c3   :  { %v3758_v58 = vpop.eup %3757 }
 0x1c4   :  { %641 = vrot.lane.b32.xlu0 %v4199_v55, %s3929_s5  ;;  %v634_v60 = vmul.f32 %v3758_v58, %v4181_v42  ;;  %v441_v61 = vpop.f32.mrb[18].mxu1 }
 0x1c5   :  { %v4211_v62 = vadd.f32 %v441_v61, %v4171_v28  ;;  %v443_v63 = vpop.f32.mrb[19].mxu1  ;;  %v637_v61 = vmul.f32 0.0, %v4199_v55 }
 0x1c6   :  { %v4214_v0 = vadd.f32 %v634_v60, %v4186_v47  ;;  %v4217_v1 = vadd.f32 %v443_v63, %v4179_v40 }
 0x1c8   :  { %643 = vrot.lane.b32.xlu0 %v4214_v0, %s3929_s5  ;;  %v447_v2 = vpop.f32.mrb[20].mxu1 }
 0x1c9   :  { %v4222_v3 = vadd.f32 %v447_v2, %v4171_v28  ;;  %v449_v4 = vpop.f32.mrb[21].mxu1  ;;  %v638_v2 = vmul.f32 0.0, %v4214_v0 }
 0x1ca   :  { %v4225_v5 = vadd.f32 %v449_v4, %v4179_v40 }
 0x1cc   :  { %v453_v6 = vpop.f32.mrb[22].mxu1 }
 0x1cd   :  { %v4228_v7 = vadd.f32 %v453_v6, %v4171_v28  ;;  %v455_v8 = vpop.f32.mrb[23].mxu1 }
 0x1ce   :  { %v4231_v9 = vadd.f32 %v455_v8, %v4179_v40 }
 0x1d0   :  { %v459_v10 = vpop.f32.mrb[24].mxu1 }
 0x1d1   :  { %v4234_v11 = vadd.f32 %v459_v10, %v4171_v28  ;;  %v461_v12 = vpop.f32.mrb[25].mxu1 }
 0x1d2   :  { %v4237_v13 = vadd.f32 %v461_v12, %v4179_v40 }
 0x1d4   :  { %v465_v14 = vpop.f32.mrb[26].mxu1 }
 0x1d5   :  { %v4240_v15 = vadd.f32 %v465_v14, %v4171_v28  ;;  %v467_v16 = vpop.f32.mrb[27].mxu1 }
 0x1d6   :  { %v4243_v17 = vadd.f32 %v467_v16, %v4179_v40 }
 0x1d8   :  { %v471_v18 = vpop.f32.mrb[28].mxu1 }
 0x1d9   :  { %v4246_v19 = vadd.f32 %v471_v18, %v4171_v28  ;;  %v473_v20 = vpop.f32.mrb[29].mxu1 }
 0x1da   :  { %v4249_v22 = vadd.f32 %v473_v20, %v4179_v40 }
 0x1dc   :  { %v477_v23 = vpop.f32.mrb[30].mxu1 }
 0x1dd   :  { %v4252_v24 = vadd.f32 %v477_v23, %v4171_v28  ;;  %v479_v25 = vpop.f32.mrb[31].mxu1 }
 0x1de   :  { %v4255_v26 = vadd.f32 %v479_v25, %v4179_v40 }
 0x1e0   :  { %v483_v27 = vpop.f32.mrb[32].mxu1 }
 0x1e1   :  { %v4258_v29 = vadd.f32 %v483_v27, %v4171_v28  ;;  %v485_v30 = vpop.f32.mrb[33].mxu1 }
 0x1e2   :  { %v4261_v33 = vadd.f32 %v485_v30, %v4179_v40 }
 0x1e4   :  { %v489_v34 = vpop.f32.mrb[34].mxu1 }
 0x1e5   :  { %v4264_v35 = vadd.f32 %v489_v34, %v4171_v28  ;;  %v491_v36 = vpop.f32.mrb[35].mxu1 }
 0x1e6   :  { %v4267_v38 = vadd.f32 %v491_v36, %v4179_v40 }
 0x1e8   :  { %v495_v39 = vpop.f32.mrb[36].mxu1 }
 0x1e9   :  { %v4270_v41 = vadd.f32 %v495_v39, %v4171_v28  ;;  %v497_v43 = vpop.f32.mrb[37].mxu1 }
 0x1ea   :  { %v4273_v45 = vadd.f32 %v497_v43, %v4179_v40 }
 0x1ec   :  { %v501_v46 = vpop.f32.mrb[38].mxu1 }
 0x1ed   :  { %v4276_v49 = vadd.f32 %v501_v46, %v4171_v28  ;;  %v503_v50 = vpop.f32.mrb[39].mxu1 }
 0x1ee   :  { %v4279_v52 = vadd.f32 %v503_v50, %v4179_v40 }
 0x236   :  { %v642_v54 = vpop.permute.xlu0 %641 }
 0x237   :  { %v647_v57 = vmul.f32 %v642_v54, %v4199_v55 }
 0x239   :  { %651 = vrot.lane.b32.xlu1 %v647_v57, %s3930_s15 }
 0x23a   :  { %v644_v58 = vpop.permute.xlu0 %643 }
 0x23b   :  { %v648_v60 = vmul.f32 %v644_v58, %v4214_v0 }
 0x23d   :  { %653 = vrot.lane.b32.xlu1 %v648_v60, %s3930_s15 }
 0x2ab   :  { %v652_v63 = vpop.permute.xlu1 %651 }
 0x2ac   :  { %v657_v28 = vadd.f32 %v652_v63, %v637_v61 }
 0x2ae   :  { %3759 = vtanh.f32 %v657_v28 }
 0x2af   :  { %v654_v4 = vpop.permute.xlu1 %653 }
 0x2b0   :  { %v658_v6 = vadd.f32 %v654_v4, %v638_v2 }
 0x2b2   :  { %3761 = vtanh.f32 %v658_v6 }
 0x2b8   :  { %v3760_v8 = vpop.eup %3759 }
 0x2b9   :  { %663 = vrot.lane.b32.xlu0 %v3760_v8, %s3929_s5 }
 0x2bc   :  { %v3762_v10 = vpop.eup %3761 }
 0x2bd   :  { %665 = vrot.lane.b32.xlu1 %v3762_v10, %s3929_s5 }
 0x32b   :  { %v664_v12 = vpop.permute.xlu0 %663 }
 0x32c   :  { %v669_v14 = vmul.f32 %v664_v12, %v4199_v55 }
 0x32e   :  { %675 = vrot.lane.b32.xlu0 %v669_v14, %s3930_s15 }
 0x32f   :  { %v666_v16 = vpop.permute.xlu1 %665 }
 0x330   :  { %v670_v18 = vmul.f32 %v666_v16, %v4214_v0 }
 0x332   :  { %677 = vrot.lane.b32.xlu1 %v670_v18, %s3930_s15 }
 0x3a0   :  { %v676_v20 = vpop.permute.xlu0 %675 }
 0x3a1   :  { %3413 = vmatprep.mubr.msk.f32.mxu0 %vm296_vm2, %v676_v20 }
 0x3a4   :  { %v678_v23 = vpop.permute.xlu1 %677 }
 0x3a5   :  { %3414 = vmatmul.mubr.msk.f32.vlgmr.msra.gmra.mrb[10].mxu0 %vm296_vm2, %v678_v23 }
 0x3a6   :  { %3629 = vmatpush3.bf16.msra.mxu0 %v4056_v21 }
 0x3a7   :  { %3631 = vmatprep.subr.bf16.mxu0 %v4083_v31 }
 0x3aa   :  { %3633 = vmatpush3.bf16.msra.mxu0 %v4083_v31 }
 0x3ab   :  { %3635 = vmatprep.subr.bf16.mxu0 %v4056_v21 }
 0x478   :  { %v3415_v55 = vpop.f32.mrb[10].mxu0 }
 0x479   :  { %v759_v25 = vadd.f32 %v3415_v55, %v4193_v51  ;;  %v749_v0 = vpop.f32.mrb[11].mxu0 }
 0x47a   :  { %v758_v27 = vadd.f32 %v749_v0, %v4184_v44 }
 0x47b   :  { %3763 = vtanh.f32 %v759_v25 }
 0x47c   :  { %3765 = vtanh.f32 %v758_v27 }
 0x485   :  { %v3764_v30 = vpop.eup %3763 }
 0x486   :  { %v3766_v34 = vpop.eup %3765  ;;  %v763_v36 = vmul.f32 %v3764_v30, %v4181_v42 }
 0x487   :  { %v762_v39 = vmul.f32 %v3766_v34, %v4181_v42 }
 0x488   :  { %v765_v43 = vadd.f32 %v763_v36, %v4186_v47 }
 0x489   :  { %v764_v46 = vadd.f32 %v762_v39, %v4186_v47 }
 0x48a   :  { %772 = vrot.lane.b32.xlu1 %v765_v43, %s3929_s5  ;;  %v767_v57 = vmul.f32 %v765_v43, %v658_v6 }
 0x48b   :  { %770 = vrot.lane.b32.xlu0 %v764_v46, %s3929_s5  ;;  %v766_v60 = vmul.f32 %v764_v46, %v657_v28 }
 0x4fc   :  { %v773_v51 = vpop.permute.xlu1 %772 }
 0x4fd   :  { %v777_v50 = vmul.f32 %v773_v51, %v765_v43  ;;  %v771_v54 = vpop.permute.xlu0 %770 }
 0x4fe   :  { %v776_v44 = vmul.f32 %v771_v54, %v764_v46 }
 0x4ff   :  { %782 = vrot.lane.b32.xlu1 %v777_v50, %s3930_s15 }
 0x500   :  { %780 = vrot.lane.b32.xlu0 %v776_v44, %s3930_s15 }
 0x571   :  { %v783_v58 = vpop.permute.xlu1 %782 }
 0x572   :  { %v787_v61 = vadd.f32 %v783_v58, %v767_v57  ;;  %v781_v63 = vpop.permute.xlu0 %780 }
 0x573   :  { %v786_v2 = vadd.f32 %v781_v63, %v766_v60 }
 0x574   :  { %3767 = vtanh.f32 %v787_v61 }
 0x575   :  { %3769 = vtanh.f32 %v786_v2 }
 0x57e   :  { %v3768_v4 = vpop.eup %3767 }
 0x57f   :  { %v3770_v8 = vpop.eup %3769  ;;  %794 = vrot.lane.b32.xlu1 %v3768_v4, %s3929_s5 }
 0x580   :  { %792 = vrot.lane.b32.xlu0 %v3770_v8, %s3929_s5 }
 0x5f1   :  { %v795_v10 = vpop.permute.xlu1 %794 }
 0x5f2   :  { %v799_v12 = vmul.f32 %v795_v10, %v765_v43  ;;  %v793_v14 = vpop.permute.xlu0 %792 }
 0x5f3   :  { %v798_v16 = vmul.f32 %v793_v14, %v764_v46 }
 0x5f4   :  { %806 = vrot.lane.b32.xlu1 %v799_v12, %s3930_s15 }
 0x5f5   :  { %804 = vrot.lane.b32.xlu0 %v798_v16, %s3930_s15 }
 0x666   :  { %v807_v6 = vpop.permute.xlu1 %806 }
 0x667   :  { %v805_v28 = vpop.permute.xlu0 %804 }
 0x668   :  { %3424 = vmatprep.mubr.msk.f32.mxu0 %vm296_vm2, %v805_v28 }
 0x669   :  { %3425 = vmatmul.mubr.msk.f32.vlgmr.msra.gmra.mrb[12].mxu0 %vm296_vm2, %v807_v6 }
 0x66a   :  { %3637 = vmatpush3.bf16.msra.mxu0 %v4056_v21 }
 0x66b   :  { %3639 = vmatprep.subr.bf16.mxu0 %v4083_v31 }
 0x66e   :  { %3641 = vmatpush3.bf16.msra.mxu0 %v4083_v31 }
 0x66f   :  { %3643 = vmatprep.subr.bf16.mxu0 %v4056_v21 }
 0x73c   :  { %v3426_v18 = vpop.f32.mrb[12].mxu0 }
 0x73d   :  { %v888_v20 = vadd.f32 %v3426_v18, %v4211_v62  ;;  %v878_v23 = vpop.f32.mrb[13].mxu0 }
 0x73e   :  { %v887_v55 = vadd.f32 %v878_v23, %v4202_v56 }
 0x73f   :  { %3771 = vtanh.f32 %v888_v20 }
 0x740   :  { %3773 = vtanh.f32 %v887_v55 }
 0x749   :  { %v3772_v25 = vpop.eup %3771 }
 0x74a   :  { %v3774_v0 = vpop.eup %3773  ;;  %v892_v27 = vmul.f32 %v3772_v25, %v4181_v42 }
 0x74b   :  { %v891_v30 = vmul.f32 %v3774_v0, %v4181_v42 }
 0x74c   :  { %v894_v34 = vadd.f32 %v892_v27, %v4186_v47 }
 0x74d   :  { %v893_v36 = vadd.f32 %v891_v30, %v4186_v47 }
 0x74e   :  { %901 = vrot.lane.b32.xlu1 %v894_v34, %s3929_s5  ;;  %v896_v46 = vmul.f32 %v894_v34, %v787_v61 }
 0x74f   :  { %899 = vrot.lane.b32.xlu0 %v893_v36, %s3929_s5  ;;  %v895_v50 = vmul.f32 %v893_v36, %v786_v2 }
 0x7c0   :  { %v902_v62 = vpop.permute.xlu1 %901 }
 0x7c1   :  { %v906_v39 = vmul.f32 %v902_v62, %v894_v34  ;;  %v900_v43 = vpop.permute.xlu0 %899 }
 0x7c2   :  { %v905_v56 = vmul.f32 %v900_v43, %v893_v36 }
 0x7c3   :  { %911 = vrot.lane.b32.xlu1 %v906_v39, %s3930_s15 }
 0x7c4   :  { %909 = vrot.lane.b32.xlu0 %v905_v56, %s3930_s15 }
 0x835   :  { %v912_v51 = vpop.permute.xlu1 %911 }
 0x836   :  { %v916_v54 = vadd.f32 %v912_v51, %v896_v46  ;;  %v910_v44 = vpop.permute.xlu0 %909 }
 0x837   :  { %v915_v57 = vadd.f32 %v910_v44, %v895_v50 }
 0x838   :  { %3775 = vtanh.f32 %v916_v54 }
 0x839   :  { %3777 = vtanh.f32 %v915_v57 }
 0x842   :  { %v3776_v58 = vpop.eup %3775 }
 0x843   :  { %v3778_v60 = vpop.eup %3777  ;;  %923 = vrot.lane.b32.xlu1 %v3776_v58, %s3929_s5 }
 0x844   :  { %921 = vrot.lane.b32.xlu0 %v3778_v60, %s3929_s5 }
 0x8b5   :  { %v924_v63 = vpop.permute.xlu1 %923 }
 0x8b6   :  { %v928_v4 = vmul.f32 %v924_v63, %v894_v34  ;;  %v922_v8 = vpop.permute.xlu0 %921 }
 0x8b7   :  { %v927_v10 = vmul.f32 %v922_v8, %v893_v36 }
 0x8b8   :  { %935 = vrot.lane.b32.xlu1 %v928_v4, %s3930_s15 }
 0x8b9   :  { %933 = vrot.lane.b32.xlu0 %v927_v10, %s3930_s15 }
 0x92a   :  { %v936_v2 = vpop.permute.xlu1 %935 }
 0x92b   :  { %v934_v61 = vpop.permute.xlu0 %933 }
 0x92c   :  { %3435 = vmatprep.mubr.msk.f32.mxu0 %vm296_vm2, %v934_v61 }
 0x92d   :  { %3436 = vmatmul.mubr.msk.f32.vlgmr.msra.gmra.mrb[14].mxu0 %vm296_vm2, %v936_v2 }
 0x92e   :  { %3645 = vmatpush3.bf16.msra.mxu0 %v4056_v21 }
 0x92f   :  { %3647 = vmatprep.subr.bf16.mxu0 %v4083_v31 }
 0x932   :  { %3649 = vmatpush3.bf16.msra.mxu0 %v4083_v31 }
 0x933   :  { %3659 = vmatprep.subr.bf16.mxu0 %v4056_v21 }
 0xa00   :  { %v3437_v12 = vpop.f32.mrb[14].mxu0 }
 0xa01   :  { %v1017_v14 = vadd.f32 %v3437_v12, %v4228_v7  ;;  %v1007_v16 = vpop.f32.mrb[15].mxu0 }
 0xa02   :  { %v1016_v28 = vadd.f32 %v1007_v16, %v4222_v3 }
 0xa03   :  { %3779 = vtanh.f32 %v1017_v14 }
 0xa04   :  { %3781 = vtanh.f32 %v1016_v28 }
 0xa0d   :  { %v3780_v6 = vpop.eup %3779 }
 0xa0e   :  { %v3782_v18 = vpop.eup %3781  ;;  %v1021_v20 = vmul.f32 %v3780_v6, %v4181_v42 }
 0xa0f   :  { %v1020_v23 = vmul.f32 %v3782_v18, %v4181_v42 }
 0xa10   :  { %v1023_v55 = vadd.f32 %v1021_v20, %v4186_v47 }
 0xa11   :  { %v1022_v25 = vadd.f32 %v1020_v23, %v4186_v47 }
 0xa12   :  { %1030 = vrot.lane.b32.xlu1 %v1023_v55, %s3929_s5  ;;  %v1025_v30 = vmul.f32 %v1023_v55, %v916_v54 }
 0xa13   :  { %1028 = vrot.lane.b32.xlu0 %v1022_v25, %s3929_s5  ;;  %v1024_v36 = vmul.f32 %v1022_v25, %v915_v57 }
 0xa84   :  { %v1031_v7 = vpop.permute.xlu1 %1030 }
 0xa85   :  { %v1035_v0 = vmul.f32 %v1031_v7, %v1023_v55  ;;  %v1029_v27 = vpop.permute.xlu0 %1028 }
 0xa86   :  { %v1034_v3 = vmul.f32 %v1029_v27, %v1022_v25 }
 0xa87   :  { %1040 = vrot.lane.b32.xlu1 %v1035_v0, %s3930_s15 }
 0xa88   :  { %1038 = vrot.lane.b32.xlu0 %v1034_v3, %s3930_s15 }
 0xaf9   :  { %v1041_v34 = vpop.permute.xlu1 %1040 }
 0xafa   :  { %v1045_v62 = vadd.f32 %v1041_v34, %v1025_v30  ;;  %v1039_v39 = vpop.permute.xlu0 %1038 }
 0xafb   :  { %v1044_v43 = vadd.f32 %v1039_v39, %v1024_v36 }
 0xafc   :  { %3783 = vtanh.f32 %v1045_v62 }
 0xafd   :  { %3785 = vtanh.f32 %v1044_v43 }
 0xb06   :  { %v3784_v56 = vpop.eup %3783 }
 0xb07   :  { %v3786_v46 = vpop.eup %3785  ;;  %1052 = vrot.lane.b32.xlu1 %v3784_v56, %s3929_s5 }
 0xb08   :  { %1050 = vrot.lane.b32.xlu0 %v3786_v46, %s3929_s5 }
 0xb79   :  { %v1053_v51 = vpop.permute.xlu1 %1052 }
 0xb7a   :  { %v1057_v50 = vmul.f32 %v1053_v51, %v1023_v55  ;;  %v1051_v44 = vpop.permute.xlu0 %1050 }
 0xb7b   :  { %v1056_v58 = vmul.f32 %v1051_v44, %v1022_v25 }
 0xb7c   :  { %1064 = vrot.lane.b32.xlu1 %v1057_v50, %s3930_s15 }
 0xb7d   :  { %1062 = vrot.lane.b32.xlu0 %v1056_v58, %s3930_s15 }
 0xbee   :  { %v1065_v57 = vpop.permute.xlu1 %1064 }
 0xbef   :  { %v1063_v54 = vpop.permute.xlu0 %1062 }
 0xbf0   :  { %3446 = vmatprep.mubr.msk.f32.mxu0 %vm296_vm2, %v1063_v54 }
 0xbf1   :  { %3447 = vmatmul.mubr.msk.f32.vlgmr.msra.gmra.mrb[16].mxu0 %vm296_vm2, %v1065_v57 }
 0xbf2   :  { %3661 = vmatpush3.bf16.msra.mxu0 %v4056_v21 }
 0xbf3   :  { %3663 = vmatprep.subr.bf16.mxu0 %v4083_v31 }
 0xbf6   :  { %3665 = vmatpush3.bf16.msra.mxu0 %v4083_v31 }
 0xcc4   :  { %v3448_v60 = vpop.f32.mrb[16].mxu0 }
 0xcc5   :  { %v1146_v63 = vadd.f32 %v3448_v60, %v4240_v15  ;;  %v1136_v4 = vpop.f32.mrb[17].mxu0 }
 0xcc6   :  { %v1145_v8 = vadd.f32 %v1136_v4, %v4234_v11 }
 0xcc7   :  { %3787 = vtanh.f32 %v1146_v63 }
 0xcc8   :  { %3789 = vtanh.f32 %v1145_v8 }
 0xcd1   :  { %v3788_v10 = vpop.eup %3787 }
 0xcd2   :  { %v3790_v61 = vpop.eup %3789  ;;  %v1150_v2 = vmul.f32 %v3788_v10, %v4181_v42 }
 0xcd3   :  { %v1149_v12 = vmul.f32 %v3790_v61, %v4181_v42 }
 0xcd4   :  { %v1152_v14 = vadd.f32 %v1150_v2, %v4186_v47 }
 0xcd5   :  { %v1151_v16 = vadd.f32 %v1149_v12, %v4186_v47 }
 0xcd6   :  { %1159 = vrot.lane.b32.xlu1 %v1152_v14, %s3929_s5  ;;  %v1154_v18 = vmul.f32 %v1152_v14, %v1045_v62 }
 0xcd7   :  { %1157 = vrot.lane.b32.xlu0 %v1151_v16, %s3929_s5  ;;  %v1153_v23 = vmul.f32 %v1151_v16, %v1044_v43 }
 0xd48   :  { %v1160_v15 = vpop.permute.xlu1 %1159 }
 0xd49   :  { %v1164_v28 = vmul.f32 %v1160_v15, %v1152_v14  ;;  %v1158_v6 = vpop.permute.xlu0 %1157 }
 0xd4a   :  { %v1163_v11 = vmul.f32 %v1158_v6, %v1151_v16 }
 0xd4b   :  { %1169 = vrot.lane.b32.xlu1 %v1164_v28, %s3930_s15 }
 0xd4c   :  { %1167 = vrot.lane.b32.xlu0 %v1163_v11, %s3930_s15 }
 0xdbd   :  { %v1170_v20 = vpop.permute.xlu1 %1169 }
 0xdbe   :  { %v1174_v55 = vadd.f32 %v1170_v20, %v1154_v18  ;;  %v1168_v25 = vpop.permute.xlu0 %1167 }
 0xdbf   :  { %v1173_v7 = vadd.f32 %v1168_v25, %v1153_v23 }
 0xdc0   :  { %3791 = vtanh.f32 %v1174_v55 }
 0xdc1   :  { %3793 = vtanh.f32 %v1173_v7 }
 0xdca   :  { %v3792_v0 = vpop.eup %3791 }
 0xdcb   :  { %v3794_v27 = vpop.eup %3793  ;;  %1181 = vrot.lane.b32.xlu1 %v3792_v0, %s3929_s5 }
 0xdcc   :  { %1179 = vrot.lane.b32.xlu0 %v3794_v27, %s3929_s5 }
 0xe3d   :  { %v1182_v3 = vpop.permute.xlu1 %1181 }
 0xe3e   :  { %v1186_v30 = vmul.f32 %v1182_v3, %v1152_v14  ;;  %v1180_v34 = vpop.permute.xlu0 %1179 }
 0xe3f   :  { %v1185_v36 = vmul.f32 %v1180_v34, %v1151_v16 }
 0xe40   :  { %1193 = vrot.lane.b32.xlu1 %v1186_v30, %s3930_s15 }
 0xe41   :  { %1191 = vrot.lane.b32.xlu0 %v1185_v36, %s3930_s15 }
 0xeb2   :  { %v1194_v39 = vpop.permute.xlu1 %1193 }
 0xeb3   :  { %v1192_v62 = vpop.permute.xlu0 %1191 }
 0xeb4   :  { %3457 = vmatprep.mubr.msk.f32.mxu1 %vm296_vm2, %v1192_v62 }
 0xeb5   :  { %3458 = vmatmul.mubr.msk.f32.vlgmr.msra.gmra.mrb[40].mxu1 %vm296_vm2, %v1194_v39 }
 0xeb6   :  { %3669 = vmatpush3.bf16.msra.mxu1 %v4056_v21 }
 0xeb7   :  { %3671 = vmatprep.subr.bf16.mxu1 %v4083_v31 }
 0xeba   :  { %3673 = vmatpush3.bf16.msra.mxu1 %v4083_v31 }
 0xf88   :  { %v3459_v43 = vpop.f32.mrb[40].mxu1 }
 0xf89   :  { %v1275_v56 = vadd.f32 %v3459_v43, %v4252_v24  ;;  %v1265_v46 = vpop.f32.mrb[41].mxu1 }
 0xf8a   :  { %v1274_v51 = vadd.f32 %v1265_v46, %v4246_v19 }
 0xf8b   :  { %3795 = vtanh.f32 %v1275_v56 }
 0xf8c   :  { %3797 = vtanh.f32 %v1274_v51 }
 0xf95   :  { %v3796_v50 = vpop.eup %3795 }
 0xf96   :  { %v3798_v44 = vpop.eup %3797  ;;  %v1279_v58 = vmul.f32 %v3796_v50, %v4181_v42 }
 0xf97   :  { %v1278_v54 = vmul.f32 %v3798_v44, %v4181_v42 }
 0xf98   :  { %v1281_v21 = vadd.f32 %v1279_v58, %v4186_v47 }
 0xf99   :  { %v1280_v57 = vadd.f32 %v1278_v54, %v4186_v47 }
 0xf9a   :  { %1288 = vrot.lane.b32.xlu1 %v1281_v21, %s3929_s5  ;;  %v1283_v63 = vmul.f32 %v1281_v21, %v1174_v55 }
 0xf9b   :  { %1286 = vrot.lane.b32.xlu0 %v1280_v57, %s3929_s5  ;;  %v1282_v8 = vmul.f32 %v1280_v57, %v1173_v7 }
0x100c   :  { %v1289_v31 = vpop.permute.xlu1 %1288 }
0x100d   :  { %v1293_v24 = vmul.f32 %v1289_v31, %v1281_v21  ;;  %v1287_v60 = vpop.permute.xlu0 %1286 }
0x100e   :  { %v1292_v19 = vmul.f32 %v1287_v60, %v1280_v57 }
0x100f   :  { %1298 = vrot.lane.b32.xlu1 %v1293_v24, %s3930_s15 }
0x1010   :  { %1296 = vrot.lane.b32.xlu0 %v1292_v19, %s3930_s15 }
0x1081   :  { %v1299_v4 = vpop.permute.xlu1 %1298 }
0x1082   :  { %v1303_v10 = vadd.f32 %v1299_v4, %v1283_v63  ;;  %v1297_v61 = vpop.permute.xlu0 %1296 }
0x1083   :  { %v1302_v2 = vadd.f32 %v1297_v61, %v1282_v8 }
0x1084   :  { %3799 = vtanh.f32 %v1303_v10 }
0x1085   :  { %3801 = vtanh.f32 %v1302_v2 }
0x108e   :  { %v3800_v12 = vpop.eup %3799 }
0x108f   :  { %v3802_v14 = vpop.eup %3801  ;;  %1310 = vrot.lane.b32.xlu1 %v3800_v12, %s3929_s5 }
0x1090   :  { %1308 = vrot.lane.b32.xlu0 %v3802_v14, %s3929_s5 }
0x1101   :  { %v1311_v16 = vpop.permute.xlu1 %1310 }
0x1102   :  { %v1315_v15 = vmul.f32 %v1311_v16, %v1281_v21  ;;  %v1309_v28 = vpop.permute.xlu0 %1308 }
0x1103   :  { %v1314_v6 = vmul.f32 %v1309_v28, %v1280_v57 }
0x1104   :  { %1322 = vrot.lane.b32.xlu1 %v1315_v15, %s3930_s15 }
0x1105   :  { %1320 = vrot.lane.b32.xlu0 %v1314_v6, %s3930_s15 }
0x1176   :  { %v1323_v18 = vpop.permute.xlu1 %1322 }
0x1177   :  { %v1321_v11 = vpop.permute.xlu0 %1320 }
0x1178   :  { %3468 = vmatprep.mubr.msk.f32.mxu0 %vm296_vm2, %v1321_v11 }
0x1179   :  { %3469 = vmatmul.mubr.msk.f32.vlgmr.msra.gmra.mrb[18].mxu0 %vm296_vm2, %v1323_v18 }
0x124c   :  { %v3470_v20 = vpop.f32.mrb[18].mxu0 }
0x124d   :  { %v1404_v23 = vadd.f32 %v3470_v20, %v4264_v35  ;;  %v1394_v55 = vpop.f32.mrb[19].mxu0 }
0x124e   :  { %v1403_v25 = vadd.f32 %v1394_v55, %v4258_v29 }
0x124f   :  { %3803 = vtanh.f32 %v1404_v23 }
0x1250   :  { %3805 = vtanh.f32 %v1403_v25  ;;  %v1574_v25 = vld [vmem:[%s4941_s7] sm:$0xff] }
0x1259   :  { %v3804_v7 = vpop.eup %3803 }
0x125a   :  { %v3806_v0 = vpop.eup %3805  ;;  %v1408_v27 = vmul.f32 %v3804_v7, %v4181_v42  ;;  %v1575_v7 = vld [vmem:[%s4941_s7 + $0x8] sm:$0xff] }
0x125b   :  { %v1407_v3 = vmul.f32 %v3806_v0, %v4181_v42  ;;  %v1576_v0 = vld [vmem:[%s4941_s7 + $0x10] sm:$0xff] }
0x125c   :  { %v1410_v30 = vadd.f32 %v1408_v27, %v4186_v47  ;;  %v4428_v27 = vpack.c.bf16 %v1575_v7, %v1574_v25 }
0x125d   :  { %v1409_v34 = vadd.f32 %v1407_v3, %v4186_v47  ;;  %v1577_v3 = vld [vmem:[%s4941_s7 + $0x18] sm:$0xff] }
0x125e   :  { %1417 = vrot.lane.b32.xlu1 %v1410_v30, %s3929_s5  ;;  %v1412_v39 = vmul.f32 %v1410_v30, %v1303_v10  ;;  %3675 = vmatprep.subr.bf16.mxu0 %v4428_v27 }
0x125f   :  { %1415 = vrot.lane.b32.xlu0 %v1409_v34, %s3929_s5  ;;  %v1411_v56 = vmul.f32 %v1409_v34, %v1302_v2  ;;  %3683 = vmatprep.subr.bf16.mxu1 %v4428_v27 }
0x1260   :  { %3677 = vmatpush3.bf16.msra.mxu0 %v4428_v27 }
0x12d0   :  { %v1418_v35 = vpop.permute.xlu1 %1417 }
0x12d1   :  { %v1422_v36 = vmul.f32 %v1418_v35, %v1410_v30  ;;  %v1416_v62 = vpop.permute.xlu0 %1415 }
0x12d2   :  { %v1421_v29 = vmul.f32 %v1416_v62, %v1409_v34 }
0x12d3   :  { %1427 = vrot.lane.b32.xlu1 %v1422_v36, %s3930_s15 }
0x12d4   :  { %1425 = vrot.lane.b32.xlu0 %v1421_v29, %s3930_s15 }
0x1345   :  { %v1428_v43 = vpop.permute.xlu1 %1427 }
0x1346   :  { %v1432_v46 = vadd.f32 %v1428_v43, %v1412_v39  ;;  %v1426_v51 = vpop.permute.xlu0 %1425 }
0x1347   :  { %v1431_v50 = vadd.f32 %v1426_v51, %v1411_v56  ;;  %v414_v51 = vadd.f32 %v4174_v32, %v4179_v40 }
0x1348   :  { %3807 = vtanh.f32 %v1432_v46 }
0x1349   :  { %3809 = vtanh.f32 %v1431_v50 }
0x1352   :  { %v3808_v44 = vpop.eup %3807 }
0x1353   :  { %v3810_v58 = vpop.eup %3809  ;;  %1439 = vrot.lane.b32.xlu1 %v3808_v44, %s3929_s5 }
0x1354   :  { %1437 = vrot.lane.b32.xlu0 %v3810_v58, %s3929_s5 }
0x13c5   :  { %v1440_v54 = vpop.permute.xlu1 %1439 }
0x13c6   :  { %v1444_v21 = vmul.f32 %v1440_v54, %v1410_v30  ;;  %v1438_v57 = vpop.permute.xlu0 %1437  ;;  %v4433_v30 = vpack.c.bf16 %v1577_v3, %v1576_v0 }
0x13c7   :  { %v1443_v31 = vmul.f32 %v1438_v57, %v1409_v34 }
0x13c8   :  { %1451 = vrot.lane.b32.xlu1 %v1444_v21, %s3930_s15  ;;  %3679 = vmatprep.subr.bf16.mxu0 %v4433_v30 }
0x13c9   :  { %1449 = vrot.lane.b32.xlu0 %v1443_v31, %s3930_s15  ;;  %3681 = vmatpush3.bf16.msra.mxu0 %v4433_v30 }
0x13ca   :  { %3691 = vmatprep.subr.bf16.mxu0 %v4428_v27 }
0x143a   :  { %v1452_v60 = vpop.permute.xlu1 %1451 }
0x143b   :  { %v1450_v24 = vpop.permute.xlu0 %1449 }
0x143c   :  { %3479 = vmatprep.mubr.msk.f32.mxu1 %vm296_vm2, %v1450_v24 }
0x143d   :  { %3480 = vmatmul.mubr.msk.f32.vlgmr.msra.gmra.mrb[42].mxu1 %vm296_vm2, %v1452_v60 }
0x143e   :  { %3685 = vmatpush3.bf16.msra.mxu1 %v4428_v27 }
0x143f   :  { %3687 = vmatprep.subr.bf16.mxu1 %v4433_v30 }
0x1442   :  { %3689 = vmatpush3.bf16.msra.mxu1 %v4433_v30 }
0x1443   :  { %3699 = vmatprep.subr.bf16.mxu1 %v4428_v27 }
0x1510   :  { %v3481_v19 = vpop.f32.mrb[42].mxu1 }
0x1511   :  { %v1533_v63 = vadd.f32 %v3481_v19, %v4276_v49  ;;  %v1523_v4 = vpop.f32.mrb[43].mxu1 }
0x1512   :  { %v1532_v8 = vadd.f32 %v1523_v4, %v4270_v41 }
0x1513   :  { %3811 = vtanh.f32 %v1533_v63 }
0x1514   :  { %3813 = vtanh.f32 %v1532_v8 }
0x151d   :  { %v3812_v10 = vpop.eup %3811 }
0x151e   :  { %v3814_v61 = vpop.eup %3813  ;;  %v1537_v2 = vmul.f32 %v3812_v10, %v4181_v42 }
0x151f   :  { %v1536_v12 = vmul.f32 %v3814_v61, %v4181_v42 }
0x1520   :  { %v1539_v14 = vadd.f32 %v1537_v2, %v4186_v47 }
0x1521   :  { %v1538_v16 = vadd.f32 %v1536_v12, %v4186_v47 }
0x1522   :  { %1546 = vrot.lane.b32.xlu1 %v1539_v14, %s3929_s5  ;;  %v1541_v6 = vmul.f32 %v1539_v14, %v1432_v46  ;;  %v420_v46 = vadd.f32 %v4177_v37, %v4179_v40 }
0x1523   :  { %1544 = vrot.lane.b32.xlu0 %v1538_v16, %s3929_s5  ;;  %v1540_v18 = vmul.f32 %v1538_v16, %v1431_v50 }
0x1594   :  { %v1547_v49 = vpop.permute.xlu1 %1546 }
0x1595   :  { %v1551_v15 = vmul.f32 %v1547_v49, %v1539_v14  ;;  %v1545_v28 = vpop.permute.xlu0 %1544 }
0x1596   :  { %v1550_v41 = vmul.f32 %v1545_v28, %v1538_v16 }
0x1597   :  { %1556 = vrot.lane.b32.xlu1 %v1551_v15, %s3930_s15 }
0x1598   :  { %1554 = vrot.lane.b32.xlu0 %v1550_v41, %s3930_s15 }
0x1609   :  { %v1557_v11 = vpop.permute.xlu1 %1556 }
0x160a   :  { %v1561_v20 = vadd.f32 %v1557_v11, %v1541_v6  ;;  %v1555_v23 = vpop.permute.xlu0 %1554 }
0x160b   :  { %v1560_v55 = vadd.f32 %v1555_v23, %v1540_v18 }
0x160c   :  { %3815 = vtanh.f32 %v1561_v20 }
0x160d   :  { %3817 = vtanh.f32 %v1560_v55 }
0x1616   :  { %v3816_v34 = vpop.eup %3815 }
0x1617   :  { %v3818_v35 = vpop.eup %3817  ;;  %1568 = vrot.lane.b32.xlu1 %v3816_v34, %s3929_s5 }
0x1618   :  { %1566 = vrot.lane.b32.xlu0 %v3818_v35, %s3929_s5 }
0x1689   :  { %v1569_v36 = vpop.permute.xlu1 %1568 }
0x168a   :  { %v1573_v62 = vmul.f32 %v1569_v36, %v1539_v14  ;;  %v1567_v29 = vpop.permute.xlu0 %1566 }
0x168b   :  { %v1572_v39 = vmul.f32 %v1567_v29, %v1538_v16 }
0x168c   :  { %1584 = vrot.lane.b32.xlu1 %v1573_v62, %s3930_s15 }
0x168d   :  { %1582 = vrot.lane.b32.xlu0 %v1572_v39, %s3930_s15 }
0x16fe   :  { %v1585_v56 = vpop.permute.xlu1 %1584 }
0x16ff   :  { %v1583_v43 = vpop.permute.xlu0 %1582 }
0x1700   :  { %3490 = vmatprep.mubr.msk.f32.mxu0 %vm296_vm2, %v1583_v43 }
0x1701   :  { %3491 = vmatmul.mubr.msk.f32.vlgmr.msra.gmra.mrb[20].mxu0 %vm296_vm2, %v1585_v56 }
0x1702   :  { %3693 = vmatpush3.bf16.msra.mxu0 %v4428_v27 }
0x1703   :  { %3695 = vmatprep.subr.bf16.mxu0 %v4433_v30 }
0x1706   :  { %3697 = vmatpush3.bf16.msra.mxu0 %v4433_v30 }
0x1707   :  { %3707 = vmatprep.subr.bf16.mxu0 %v4428_v27 }
0x17d4   :  { %v3492_v50 = vpop.f32.mrb[20].mxu0 }
0x17d5   :  { %v1666_v44 = vadd.f32 %v3492_v50, %v420_v46  ;;  %v1656_v58 = vpop.f32.mrb[21].mxu0 }
0x17d6   :  { %v1665_v54 = vadd.f32 %v1656_v58, %v414_v51 }
0x17d7   :  { %3819 = vtanh.f32 %v1666_v44 }
0x17d8   :  { %3821 = vtanh.f32 %v1665_v54 }
0x17e1   :  { %v3820_v21 = vpop.eup %3819 }
0x17e2   :  { %v3822_v57 = vpop.eup %3821  ;;  %v1670_v31 = vmul.f32 %v3820_v21, %v4181_v42 }
0x17e3   :  { %v1669_v24 = vmul.f32 %v3822_v57, %v4181_v42 }
0x17e4   :  { %v1672_v60 = vadd.f32 %v1670_v31, %v4186_v47 }
0x17e5   :  { %v1671_v19 = vadd.f32 %v1669_v24, %v4186_v47 }
0x17e6   :  { %1679 = vrot.lane.b32.xlu1 %v1672_v60, %s3929_s5  ;;  %v1674_v4 = vmul.f32 %v1672_v60, %v1561_v20 }
0x17e7   :  { %1677 = vrot.lane.b32.xlu0 %v1671_v19, %s3929_s5  ;;  %v1673_v10 = vmul.f32 %v1671_v19, %v1560_v55 }
0x1858   :  { %v1680_v32 = vpop.permute.xlu1 %1679 }
0x1859   :  { %v1684_v37 = vmul.f32 %v1680_v32, %v1672_v60  ;;  %v1678_v40 = vpop.permute.xlu0 %1677 }
0x185a   :  { %v1683_v63 = vmul.f32 %v1678_v40, %v1671_v19 }
0x185b   :  { %1689 = vrot.lane.b32.xlu1 %v1684_v37, %s3930_s15 }
0x185c   :  { %1687 = vrot.lane.b32.xlu0 %v1683_v63, %s3930_s15 }
0x18cd   :  { %v1690_v8 = vpop.permute.xlu1 %1689 }
0x18ce   :  { %v1694_v61 = vadd.f32 %v1690_v8, %v1674_v4  ;;  %v1688_v2 = vpop.permute.xlu0 %1687 }
0x18cf   :  { %v1693_v12 = vadd.f32 %v1688_v2, %v1673_v10 }
0x18d0   :  { %3823 = vtanh.f32 %v1694_v61 }
0x18d1   :  { %3825 = vtanh.f32 %v1693_v12 }
0x18da   :  { %v3824_v14 = vpop.eup %3823 }
0x18db   :  { %v3826_v16 = vpop.eup %3825  ;;  %1701 = vrot.lane.b32.xlu1 %v3824_v14, %s3929_s5 }
0x18dc   :  { %1699 = vrot.lane.b32.xlu0 %v3826_v16, %s3929_s5 }
0x194d   :  { %v1702_v49 = vpop.permute.xlu1 %1701 }
0x194e   :  { %v1706_v15 = vmul.f32 %v1702_v49, %v1672_v60  ;;  %v1700_v28 = vpop.permute.xlu0 %1699 }
0x194f   :  { %v1705_v41 = vmul.f32 %v1700_v28, %v1671_v19 }
0x1950   :  { %1711 = vrot.lane.b32.xlu1 %v1706_v15, %s3930_s15 }
0x1951   :  { %1709 = vrot.lane.b32.xlu0 %v1705_v41, %s3930_s15 }
0x19c2   :  { %v1712_v6 = vpop.permute.xlu1 %1711 }
0x19c3   :  { %1716 = vst.msk [vmem:[#allocation3 + $0x8] sm:$0xff] %vm296_vm2, %v1712_v6  ;;  %v1710_v11 = vpop.permute.xlu0 %1709 }
0x19c4   :  { %1715 = vst.msk [vmem:[#allocation3] sm:$0xff] %vm296_vm2, %v1710_v11  ;;  %3501 = vmatprep.mubr.msk.f32.mxu1 %vm296_vm2, %v1710_v11 }
0x19c5   :  { %3502 = vmatmul.mubr.msk.f32.vlgmr.msra.gmra.mrb[44].mxu1 %vm296_vm2, %v1712_v6 }
0x19c6   :  { %3701 = vmatpush3.bf16.msra.mxu1 %v4428_v27 }
0x19c7   :  { %3703 = vmatprep.subr.bf16.mxu1 %v4433_v30 }
0x19ca   :  { %3705 = vmatpush3.bf16.msra.mxu1 %v4433_v30 }
0x19cb   :  { %3715 = vmatprep.subr.bf16.mxu1 %v4428_v27 }
0x1a98   :  { %v3503_v18 = vpop.f32.mrb[44].mxu1 }
0x1a99   :  { %v1799_v20 = vadd.f32 %v3503_v18, %v4196_v53  ;;  %v1789_v23 = vpop.f32.mrb[45].mxu1 }
0x1a9a   :  { %v1798_v55 = vadd.f32 %v1789_v23, %v4189_v48 }
0x1a9b   :  { %3827 = vtanh.f32 %v1799_v20 }
0x1a9c   :  { %3829 = vtanh.f32 %v1798_v55 }
0x1aa5   :  { %v3828_v25 = vpop.eup %3827 }
0x1aa6   :  { %v3830_v7 = vpop.eup %3829  ;;  %v1803_v0 = vmul.f32 %v3828_v25, %v4181_v42 }
0x1aa7   :  { %v1802_v3 = vmul.f32 %v3830_v7, %v4181_v42 }
0x1aa8   :  { %v1805_v34 = vadd.f32 %v1803_v0, %v4186_v47 }
0x1aa9   :  { %v1804_v35 = vadd.f32 %v1802_v3, %v4186_v47 }
0x1aaa   :  { %1812 = vrot.lane.b32.xlu1 %v1805_v34, %s3929_s5  ;;  %v1807_v29 = vmul.f32 %v1805_v34, %v1694_v61 }
0x1aab   :  { %1810 = vrot.lane.b32.xlu0 %v1804_v35, %s3929_s5  ;;  %v1806_v43 = vmul.f32 %v1804_v35, %v1693_v12 }
0x1b1c   :  { %v1813_v53 = vpop.permute.xlu1 %1812 }
0x1b1d   :  { %v1817_v36 = vmul.f32 %v1813_v53, %v1805_v34  ;;  %v1811_v62 = vpop.permute.xlu0 %1810 }
0x1b1e   :  { %v1816_v48 = vmul.f32 %v1811_v62, %v1804_v35 }
0x1b1f   :  { %1822 = vrot.lane.b32.xlu1 %v1817_v36, %s3930_s15 }
0x1b20   :  { %1820 = vrot.lane.b32.xlu0 %v1816_v48, %s3930_s15 }
0x1b91   :  { %v1823_v39 = vpop.permute.xlu1 %1822 }
0x1b92   :  { %v1827_v56 = vadd.f32 %v1823_v39, %v1807_v29  ;;  %v1821_v46 = vpop.permute.xlu0 %1820 }
0x1b93   :  { %v1826_v51 = vadd.f32 %v1821_v46, %v1806_v43 }
0x1b94   :  { %3831 = vtanh.f32 %v1827_v56 }
0x1b95   :  { %3833 = vtanh.f32 %v1826_v51 }
0x1b9e   :  { %v3832_v50 = vpop.eup %3831 }
0x1b9f   :  { %v3834_v44 = vpop.eup %3833  ;;  %1834 = vrot.lane.b32.xlu1 %v3832_v50, %s3929_s5 }
0x1ba0   :  { %1832 = vrot.lane.b32.xlu0 %v3834_v44, %s3929_s5 }
0x1c11   :  { %v1835_v58 = vpop.permute.xlu1 %1834 }
0x1c12   :  { %v1839_v54 = vmul.f32 %v1835_v58, %v1805_v34  ;;  %v1833_v21 = vpop.permute.xlu0 %1832 }
0x1c13   :  { %v1838_v57 = vmul.f32 %v1833_v21, %v1804_v35 }
0x1c14   :  { %1844 = vrot.lane.b32.xlu1 %v1839_v54, %s3930_s15 }
0x1c15   :  { %1842 = vrot.lane.b32.xlu0 %v1838_v57, %s3930_s15 }
0x1c86   :  { %v1845_v31 = vpop.permute.xlu1 %1844 }
0x1c87   :  { %1849 = vst.msk [vmem:[#allocation3 + $0x18] sm:$0xff] %vm296_vm2, %v1845_v31  ;;  %v1843_v24 = vpop.permute.xlu0 %1842 }
0x1c88   :  { %1848 = vst.msk [vmem:[#allocation3 + $0x10] sm:$0xff] %vm296_vm2, %v1843_v24  ;;  %3512 = vmatprep.mubr.msk.f32.mxu0 %vm296_vm2, %v1843_v24 }
0x1c89   :  { %3513 = vmatmul.mubr.msk.f32.vlgmr.msra.gmra.mrb[22].mxu0 %vm296_vm2, %v1845_v31 }
0x1c8a   :  { %3709 = vmatpush3.bf16.msra.mxu0 %v4428_v27 }
0x1c8b   :  { %3711 = vmatprep.subr.bf16.mxu0 %v4433_v30 }
0x1c8e   :  { %3713 = vmatpush3.bf16.msra.mxu0 %v4433_v30 }
0x1c8f   :  { %3723 = vmatprep.subr.bf16.mxu0 %v4428_v27 }
0x1d5c   :  { %v3514_v60 = vpop.f32.mrb[22].mxu0 }
0x1d5d   :  { %v1932_v19 = vadd.f32 %v3514_v60, %v4217_v1  ;;  %v1922_v32 = vpop.f32.mrb[23].mxu0 }
0x1d5e   :  { %v1931_v37 = vadd.f32 %v1922_v32, %v4205_v59 }
0x1d5f   :  { %3835 = vtanh.f32 %v1932_v19 }
0x1d60   :  { %3837 = vtanh.f32 %v1931_v37 }
0x1d69   :  { %v3836_v40 = vpop.eup %3835 }
0x1d6a   :  { %v3838_v63 = vpop.eup %3837  ;;  %v1936_v4 = vmul.f32 %v3836_v40, %v4181_v42 }
0x1d6b   :  { %v1935_v8 = vmul.f32 %v3838_v63, %v4181_v42 }
0x1d6c   :  { %v1938_v10 = vadd.f32 %v1936_v4, %v4186_v47 }
0x1d6d   :  { %v1937_v61 = vadd.f32 %v1935_v8, %v4186_v47 }
0x1d6e   :  { %1945 = vrot.lane.b32.xlu1 %v1938_v10, %s3929_s5  ;;  %v1940_v14 = vmul.f32 %v1938_v10, %v1827_v56 }
0x1d6f   :  { %1943 = vrot.lane.b32.xlu0 %v1937_v61, %s3929_s5  ;;  %v1939_v49 = vmul.f32 %v1937_v61, %v1826_v51 }
0x1de0   :  { %v1946_v1 = vpop.permute.xlu1 %1945 }
0x1de1   :  { %v1950_v2 = vmul.f32 %v1946_v1, %v1938_v10  ;;  %v1944_v12 = vpop.permute.xlu0 %1943 }
0x1de2   :  { %v1949_v59 = vmul.f32 %v1944_v12, %v1937_v61 }
0x1de3   :  { %1955 = vrot.lane.b32.xlu1 %v1950_v2, %s3930_s15 }
0x1de4   :  { %1953 = vrot.lane.b32.xlu0 %v1949_v59, %s3930_s15 }
0x1e55   :  { %v1956_v16 = vpop.permute.xlu1 %1955 }
0x1e56   :  { %v1960_v15 = vadd.f32 %v1956_v16, %v1940_v14  ;;  %v1954_v28 = vpop.permute.xlu0 %1953 }
0x1e57   :  { %v1959_v41 = vadd.f32 %v1954_v28, %v1939_v49 }
0x1e58   :  { %3839 = vtanh.f32 %v1960_v15 }
0x1e59   :  { %3841 = vtanh.f32 %v1959_v41 }
0x1e62   :  { %v3840_v6 = vpop.eup %3839 }
0x1e63   :  { %v3842_v11 = vpop.eup %3841  ;;  %1967 = vrot.lane.b32.xlu1 %v3840_v6, %s3929_s5 }
0x1e64   :  { %1965 = vrot.lane.b32.xlu0 %v3842_v11, %s3929_s5 }
0x1ed5   :  { %v1968_v18 = vpop.permute.xlu1 %1967 }
0x1ed6   :  { %v1972_v20 = vmul.f32 %v1968_v18, %v1938_v10  ;;  %v1966_v23 = vpop.permute.xlu0 %1965 }
0x1ed7   :  { %v1971_v55 = vmul.f32 %v1966_v23, %v1937_v61 }
0x1ed8   :  { %1977 = vrot.lane.b32.xlu1 %v1972_v20, %s3930_s15 }
0x1ed9   :  { %1975 = vrot.lane.b32.xlu0 %v1971_v55, %s3930_s15 }
0x1f4a   :  { %v1978_v25 = vpop.permute.xlu1 %1977 }
0x1f4b   :  { %1982 = vst.msk [vmem:[#allocation3 + $0x28] sm:$0xff] %vm296_vm2, %v1978_v25  ;;  %v1976_v7 = vpop.permute.xlu0 %1975 }
0x1f4c   :  { %1981 = vst.msk [vmem:[#allocation3 + $0x20] sm:$0xff] %vm296_vm2, %v1976_v7  ;;  %3523 = vmatprep.mubr.msk.f32.mxu1 %vm296_vm2, %v1976_v7 }
0x1f4d   :  { %3524 = vmatmul.mubr.msk.f32.vlgmr.msra.gmra.mrb[46].mxu1 %vm296_vm2, %v1978_v25 }
0x1f4e   :  { %3717 = vmatpush3.bf16.msra.mxu1 %v4428_v27 }
0x1f4f   :  { %3719 = vmatprep.subr.bf16.mxu1 %v4433_v30 }
0x1f52   :  { %3721 = vmatpush3.bf16.msra.mxu1 %v4433_v30 }
0x1f53   :  { %3731 = vmatprep.subr.bf16.mxu1 %v4428_v27 }
0x2020   :  { %v3525_v0 = vpop.f32.mrb[46].mxu1 }
0x2021   :  { %v2065_v3 = vadd.f32 %v3525_v0, %v4231_v9  ;;  %v2055_v34 = vpop.f32.mrb[47].mxu1 }
0x2022   :  { %v2064_v35 = vadd.f32 %v2055_v34, %v4225_v5 }
0x2023   :  { %3843 = vtanh.f32 %v2065_v3 }
0x2024   :  { %3845 = vtanh.f32 %v2064_v35 }
0x202d   :  { %v3844_v53 = vpop.eup %3843 }
0x202e   :  { %v3846_v36 = vpop.eup %3845  ;;  %v2069_v62 = vmul.f32 %v3844_v53, %v4181_v42 }
0x202f   :  { %v2068_v48 = vmul.f32 %v3846_v36, %v4181_v42 }
0x2030   :  { %v2071_v29 = vadd.f32 %v2069_v62, %v4186_v47 }
0x2031   :  { %v2070_v39 = vadd.f32 %v2068_v48, %v4186_v47 }
0x2032   :  { %2078 = vrot.lane.b32.xlu1 %v2071_v29, %s3929_s5  ;;  %v2073_v46 = vmul.f32 %v2071_v29, %v1960_v15 }
0x2033   :  { %2076 = vrot.lane.b32.xlu0 %v2070_v39, %s3929_s5  ;;  %v2072_v50 = vmul.f32 %v2070_v39, %v1959_v41 }
0x20a4   :  { %v2079_v9 = vpop.permute.xlu1 %2078 }
0x20a5   :  { %v2083_v43 = vmul.f32 %v2079_v9, %v2071_v29  ;;  %v2077_v56 = vpop.permute.xlu0 %2076 }
0x20a6   :  { %v2082_v5 = vmul.f32 %v2077_v56, %v2070_v39 }
0x20a7   :  { %2088 = vrot.lane.b32.xlu1 %v2083_v43, %s3930_s15 }
0x20a8   :  { %2086 = vrot.lane.b32.xlu0 %v2082_v5, %s3930_s15 }
0x2119   :  { %v2089_v51 = vpop.permute.xlu1 %2088 }
0x211a   :  { %v2093_v44 = vadd.f32 %v2089_v51, %v2073_v46  ;;  %v2087_v58 = vpop.permute.xlu0 %2086 }
0x211b   :  { %v2092_v54 = vadd.f32 %v2087_v58, %v2072_v50 }
0x211c   :  { %3847 = vtanh.f32 %v2093_v44 }
0x211d   :  { %3849 = vtanh.f32 %v2092_v54 }
0x2126   :  { %v3848_v21 = vpop.eup %3847 }
0x2127   :  { %v3850_v57 = vpop.eup %3849  ;;  %2100 = vrot.lane.b32.xlu1 %v3848_v21, %s3929_s5  ;;  %v2664_v21 = vld [vmem:[%s4942_s8] sm:$0xff] }
0x2128   :  { %2098 = vrot.lane.b32.xlu0 %v3850_v57, %s3929_s5  ;;  %v2665_v57 = vld [vmem:[%s4942_s8 + $0x8] sm:$0xff] }
0x2199   :  { %v2101_v31 = vpop.permute.xlu1 %2100 }
0x219a   :  { %v2105_v24 = vmul.f32 %v2101_v31, %v2071_v29  ;;  %v2099_v60 = vpop.permute.xlu0 %2098  ;;  %v3738_v31 = vpack.c.bf16 %v2665_v57, %v2664_v21 }
0x219b   :  { %v2104_v19 = vmul.f32 %v2099_v60, %v2070_v39 }
0x219c   :  { %2110 = vrot.lane.b32.xlu1 %v2105_v24, %s3930_s15 }
0x219d   :  { %2108 = vrot.lane.b32.xlu0 %v2104_v19, %s3930_s15 }
0x220e   :  { %v2111_v32 = vpop.permute.xlu1 %2110 }
0x220f   :  { %2115 = vst.msk [vmem:[#allocation3 + $0x38] sm:$0xff] %vm296_vm2, %v2111_v32  ;;  %v2109_v37 = vpop.permute.xlu0 %2108 }
0x2210   :  { %2114 = vst.msk [vmem:[#allocation3 + $0x30] sm:$0xff] %vm296_vm2, %v2109_v37  ;;  %3534 = vmatprep.mubr.msk.f32.mxu0 %vm296_vm2, %v2109_v37  ;;  %v2666_v37 = vld [vmem:[%s4942_s8 + $0x10] sm:$0xff] }
0x2211   :  { %3535 = vmatmul.mubr.msk.f32.vlgmr.msra.gmra.mrb[24].mxu0 %vm296_vm2, %v2111_v32 }
0x2212   :  { %3725 = vmatpush3.bf16.msra.mxu0 %v4428_v27 }
0x2213   :  { %3727 = vmatprep.subr.bf16.mxu0 %v4433_v30 }
0x2216   :  { %3729 = vmatpush3.bf16.msra.mxu0 %v4433_v30 }
0x2217   :  { %3739 = vmatprep.subr.bf16.mxu0 %v3738_v31 }
0x22e4   :  { %v3536_v40 = vpop.f32.mrb[24].mxu0 }
0x22e5   :  { %v2198_v63 = vadd.f32 %v3536_v40, %v4243_v17  ;;  %v2188_v4 = vpop.f32.mrb[25].mxu0  ;;  %v2667_v40 = vld [vmem:[%s4942_s8 + $0x18] sm:$0xff] }
0x22e6   :  { %v2197_v8 = vadd.f32 %v2188_v4, %v4237_v13 }
0x22e7   :  { %3851 = vtanh.f32 %v2198_v63 }
0x22e8   :  { %3853 = vtanh.f32 %v2197_v8  ;;  %v3742_v8 = vpack.c.bf16 %v2667_v40, %v2666_v37 }
0x22f1   :  { %v3852_v10 = vpop.eup %3851 }
0x22f2   :  { %v3854_v61 = vpop.eup %3853  ;;  %v2202_v1 = vmul.f32 %v3852_v10, %v4181_v42  ;;  %v2648_v10 = vld [vmem:[#allocation3] sm:$0xff] }
0x22f3   :  { %v2201_v2 = vmul.f32 %v3854_v61, %v4181_v42  ;;  %v2649_v61 = vld [vmem:[#allocation3 + $0x8] sm:$0xff] }
0x22f4   :  { %v2204_v12 = vadd.f32 %v2202_v1, %v4186_v47  ;;  %v2650_v1 = vld [vmem:[#allocation3 + $0x10] sm:$0xff] }
0x22f5   :  { %v2203_v59 = vadd.f32 %v2201_v2, %v4186_v47  ;;  %v2651_v2 = vld [vmem:[#allocation3 + $0x18] sm:$0xff] }
0x22f6   :  { %2211 = vrot.lane.b32.xlu1 %v2204_v12, %s3929_s5  ;;  %v2206_v49 = vmul.f32 %v2204_v12, %v2093_v44 }
0x22f7   :  { %2209 = vrot.lane.b32.xlu0 %v2203_v59, %s3929_s5  ;;  %v2205_v28 = vmul.f32 %v2203_v59, %v2092_v54 }
0x2368   :  { %v2212_v17 = vpop.permute.xlu1 %2211 }
0x2369   :  { %v2216_v14 = vmul.f32 %v2212_v17, %v2204_v12  ;;  %v2210_v16 = vpop.permute.xlu0 %2209  ;;  %v2654_v17 = vld [vmem:[#allocation3 + $0x30] sm:$0xff] }
0x236a   :  { %v2215_v13 = vmul.f32 %v2210_v16, %v2203_v59 }
0x236b   :  { %2221 = vrot.lane.b32.xlu1 %v2216_v14, %s3930_s15  ;;  %v2655_v14 = vld [vmem:[#allocation3 + $0x38] sm:$0xff] }
0x236c   :  { %2219 = vrot.lane.b32.xlu0 %v2215_v13, %s3930_s15 }
0x23dd   :  { %v2222_v15 = vpop.permute.xlu1 %2221 }
0x23de   :  { %v2226_v41 = vadd.f32 %v2222_v15, %v2206_v49  ;;  %v2220_v6 = vpop.permute.xlu0 %2219 }
0x23df   :  { %v2225_v11 = vadd.f32 %v2220_v6, %v2205_v28 }
0x23e0   :  { %3855 = vtanh.f32 %v2226_v41 }
0x23e1   :  { %3857 = vtanh.f32 %v2225_v11 }
0x23ea   :  { %v3856_v18 = vpop.eup %3855 }
0x23eb   :  { %v3858_v20 = vpop.eup %3857  ;;  %2233 = vrot.lane.b32.xlu1 %v3856_v18, %s3929_s5  ;;  %v4618_v18 = vld [vmem:[%s4943_s9] ss:$0 sm:$0xff] }
0x23ec   :  { %2231 = vrot.lane.b32.xlu0 %v3858_v20, %s3929_s5 }
0x245d   :  { %v2234_v23 = vpop.permute.xlu1 %2233 }
0x245e   :  { %v2238_v55 = vmul.f32 %v2234_v23, %v2204_v12  ;;  %v2232_v25 = vpop.permute.xlu0 %2231  ;;  %v2652_v12 = vld [vmem:[#allocation3 + $0x20] sm:$0xff] }
0x245f   :  { %v2237_v7 = vmul.f32 %v2232_v25, %v2203_v59  ;;  %v2653_v59 = vld [vmem:[#allocation3 + $0x28] sm:$0xff] }
0x2460   :  { %2243 = vrot.lane.b32.xlu1 %v2238_v55, %s3930_s15 }
0x2461   :  { %2241 = vrot.lane.b32.xlu0 %v2237_v7, %s3930_s15 }
0x24d2   :  { %v2244_v0 = vpop.permute.xlu1 %2243 }
0x24d3   :  { %2248 = vst.msk [vmem:[#allocation3 + $0x48] sm:$0xff] %vm296_vm2, %v2244_v0  ;;  %v2242_v3 = vpop.permute.xlu0 %2241 }
0x24d4   :  { %2247 = vst.msk [vmem:[#allocation3 + $0x40] sm:$0xff] %vm296_vm2, %v2242_v3  ;;  %3545 = vmatprep.mubr.msk.f32.mxu1 %vm296_vm2, %v2242_v3 }
0x24d5   :  { %3546 = vmatmul.mubr.msk.f32.vlgmr.msra.gmra.mrb[48].mxu1 %vm296_vm2, %v2244_v0 }
0x24d6   :  { %3733 = vmatpush3.bf16.msra.mxu1 %v4428_v27 }
0x24d7   :  { %3735 = vmatprep.subr.bf16.mxu1 %v4433_v30 }
0x24da   :  { %3737 = vmatpush3.bf16.msra.mxu1 %v4433_v30  ;;  %v2657_v13 = vld [vmem:[#allocation3 + $0x48] sm:$0xff] }
0x24db   :  { %v2656_v16 = vld [vmem:[#allocation3 + $0x40] sm:$0xff] }
0x25a8   :  { %v3547_v34 = vpop.f32.mrb[48].mxu1 }
0x25a9   :  { %v2331_v35 = vadd.f32 %v3547_v34, %v4255_v26  ;;  %v2321_v53 = vpop.f32.mrb[49].mxu1 }
0x25aa   :  { %v2330_v36 = vadd.f32 %v2321_v53, %v4249_v22 }
0x25ab   :  { %3859 = vtanh.f32 %v2331_v35 }
0x25ac   :  { %3861 = vtanh.f32 %v2330_v36 }
0x25b5   :  { %v3860_v62 = vpop.eup %3859 }
0x25b6   :  { %v3862_v48 = vpop.eup %3861  ;;  %v2335_v29 = vmul.f32 %v3860_v62, %v4181_v42 }
0x25b7   :  { %v2334_v39 = vmul.f32 %v3862_v48, %v4181_v42 }
0x25b8   :  { %v2337_v27 = vadd.f32 %v2335_v29, %v4186_v47 }
0x25b9   :  { %v2336_v9 = vadd.f32 %v2334_v39, %v4186_v47 }
0x25ba   :  { %2344 = vrot.lane.b32.xlu1 %v2337_v27, %s3929_s5  ;;  %v2339_v56 = vmul.f32 %v2337_v27, %v2226_v41 }
0x25bb   :  { %2342 = vrot.lane.b32.xlu0 %v2336_v9, %s3929_s5  ;;  %v2338_v46 = vmul.f32 %v2336_v9, %v2225_v11 }
0x262c   :  { %v2345_v26 = vpop.permute.xlu1 %2344 }
0x262d   :  { %v2349_v30 = vmul.f32 %v2345_v26, %v2337_v27  ;;  %v2343_v43 = vpop.permute.xlu0 %2342 }
0x262e   :  { %v2348_v22 = vmul.f32 %v2343_v43, %v2336_v9 }
0x262f   :  { %2354 = vrot.lane.b32.xlu1 %v2349_v30, %s3930_s15 }
0x2630   :  { %2352 = vrot.lane.b32.xlu0 %v2348_v22, %s3930_s15 }
0x26a1   :  { %v2355_v5 = vpop.permute.xlu1 %2354 }
0x26a2   :  { %v4575_v51 = vadd.f32 %v2355_v5, %v2339_v56  ;;  %v2353_v50 = vpop.permute.xlu0 %2352 }
0x26a3   :  { %v4577_v44 = vadd.f32 %v2353_v50, %v2338_v46 }
0x26a4   :  { %3863 = vtanh.f32 %v4575_v51 }
0x26a5   :  { %3865 = vtanh.f32 %v4577_v44 }
0x26ae   :  { %v3864_v58 = vpop.eup %3863 }
0x26af   :  { %v3866_v54 = vpop.eup %3865  ;;  %2366 = vrot.lane.b32.xlu1 %v3864_v58, %s3929_s5 }
0x26b0   :  { %2364 = vrot.lane.b32.xlu0 %v3866_v54, %s3929_s5 }
0x2721   :  { %v2367_v24 = vpop.permute.xlu1 %2366 }
0x2722   :  { %v2371_v60 = vmul.f32 %v2367_v24, %v2337_v27  ;;  %v2365_v19 = vpop.permute.xlu0 %2364 }
0x2723   :  { %v2370_v32 = vmul.f32 %v2365_v19, %v2336_v9 }
0x2724   :  { %2376 = vrot.lane.b32.xlu1 %v2371_v60, %s3930_s15 }
0x2725   :  { %2374 = vrot.lane.b32.xlu0 %v2370_v32, %s3930_s15 }
0x2796   :  { %v2377_v63 = vpop.permute.xlu1 %2376 }
0x2797   :  { %2381 = vst.msk [vmem:[#allocation3 + $0x58] sm:$0xff] %vm296_vm2, %v2377_v63  ;;  %v2375_v4 = vpop.permute.xlu0 %2374 }
0x2798   :  { %2380 = vst.msk [vmem:[#allocation3 + $0x50] sm:$0xff] %vm296_vm2, %v2375_v4  ;;  %3556 = vmatprep.mubr.msk.f32.mxu0 %vm296_vm2, %v2375_v4 }
0x2799   :  { %3557 = vmatmul.mubr.msk.f32.vlgmr.msra.gmra.mrb[26].mxu0 %vm296_vm2, %v2377_v63 }
0x279a   :  { %3741 = vmatpush3.bf16.msra.mxu0 %v3738_v31  ;;  %3578 = vmatprep.mubr.msk.f32.mxu0 %vm296_vm2, %v2648_v10 }
0x279b   :  { %3743 = vmatprep.subr.bf16.mxu0 %v3742_v8 }
0x279e   :  { %3745 = vmatpush3.bf16.msra.mxu0 %v3742_v8  ;;  %v2659_v15 = vld [vmem:[#allocation3 + $0x58] sm:$0xff] }
0x279f   :  { %v2658_v49 = vld [vmem:[#allocation3 + $0x50] sm:$0xff] }
0x27a1   :  { %3579 = vmatmul.mubr.msk.f32.vlgmr.msra.gmra.mrb[28].mxu0 %vm296_vm2, %v2649_v61 }
0x27a2   :  { %3581 = vmatprep.mubr.msk.f32.mxu0 %vm296_vm2, %v2650_v1 }
0x27a5   :  { %3582 = vmatmul.mubr.msk.f32.gmra.mrb[30].mxu0 %vm296_vm2, %v2651_v2 }
0x27a6   :  { %3584 = vmatprep.mubr.msk.f32.mxu0 %vm296_vm2, %v2652_v12 }
0x27a9   :  { %3585 = vmatmul.mubr.msk.f32.gmra.mrb[32].mxu0 %vm296_vm2, %v2653_v59 }
0x27aa   :  { %3587 = vmatprep.mubr.msk.f32.mxu0 %vm296_vm2, %v2654_v17 }
0x27ad   :  { %3588 = vmatmul.mubr.msk.f32.gmra.mrb[34].mxu0 %vm296_vm2, %v2655_v14 }
0x27ae   :  { %3590 = vmatprep.mubr.msk.f32.mxu0 %vm296_vm2, %v2656_v16 }
0x27b1   :  { %3591 = vmatmul.mubr.msk.f32.gmra.mrb[36].mxu0 %vm296_vm2, %v2657_v13 }
0x27b2   :  { %3593 = vmatprep.mubr.msk.f32.mxu0 %vm296_vm2, %v2658_v49 }
0x27b5   :  { %3594 = vmatmul.mubr.msk.f32.gmra.mrb[38].mxu0 %vm296_vm2, %v2659_v15 }
0x286c   :  { %v3558_v28 = vpop.f32.mrb[26].mxu0 }
0x286d   :  { %v2464_v41 = vadd.f32 %v3558_v28, %v4267_v38  ;;  %v2454_v6 = vpop.f32.mrb[27].mxu0 }
0x286e   :  { %v2463_v11 = vadd.f32 %v2454_v6, %v4261_v33 }
0x286f   :  { %3867 = vtanh.f32 %v2464_v41 }
0x2870   :  { %3869 = vtanh.f32 %v2463_v11 }
0x2874   :  { %v3580_v20 = vpop.f32.mrb[28].mxu0 }
0x2875   :  { %v4621_v23 = vadd.f32 %v3580_v20, %v4618_v18  ;;  %v2789_v55 = vpop.f32.mrb[29].mxu0 }
0x2876   :  { %v4624_v25 = vadd.f32 %v4618_v18, %v2789_v55 }
0x2877   :  { %2870 = vst.msk [vmem:[%s4944_s10 + $0x8] sm:$0xff] %vm2868_vm6, %v4621_v23 }
0x2878   :  { %2869 = vst.msk [vmem:[%s4944_s10] sm:$0xff] %vm2868_vm6, %v4624_v25  ;;  %v3583_v33 = vpop.f32.mrb[30].mxu0 }
0x2879   :  { %v3868_v38 = vpop.eup %3867  ;;  %v4637_v7 = vadd.f32 %v3583_v33, %v4618_v18  ;;  %v2799_v0 = vpop.f32.mrb[31].mxu0 }
0x287a   :  { %v3870_v3 = vpop.eup %3869  ;;  %v4640_v34 = vadd.f32 %v4618_v18, %v2799_v0  ;;  %v2468_v35 = vmul.f32 %v3868_v38, %v4181_v42 }
0x287b   :  { %2872 = vst.msk [vmem:[%s4944_s10 + $0x18] sm:$0xff] %vm2868_vm6, %v4637_v7  ;;  %v2467_v53 = vmul.f32 %v3870_v3, %v4181_v42 }
0x287c   :  { %2871 = vst.msk [vmem:[%s4944_s10 + $0x10] sm:$0xff] %vm2868_vm6, %v4640_v34  ;;  %v3586_v36 = vpop.f32.mrb[32].mxu0  ;;  %v2470_v62 = vadd.f32 %v2468_v35, %v4186_v47 }
0x287d   :  { %v4656_v48 = vadd.f32 %v3586_v36, %v4618_v18  ;;  %v2809_v29 = vpop.f32.mrb[33].mxu0  ;;  %v2469_v39 = vadd.f32 %v2467_v53, %v4186_v47 }
0x287e   :  { %v4660_v27 = vadd.f32 %v4618_v18, %v2809_v29  ;;  %2477 = vrot.lane.b32.xlu1 %v2470_v62, %s3929_s5  ;;  %v2472_v19 = vmul.f32 %v2470_v62, %v4575_v51 }
0x287f   :  { %2874 = vst.msk [vmem:[%s4944_s10 + $0x28] sm:$0xff] %vm2868_vm6, %v4656_v48  ;;  %2475 = vrot.lane.b32.xlu0 %v2469_v39, %s3929_s5  ;;  %v2471_v37 = vmul.f32 %v2469_v39, %v4577_v44 }
0x2880   :  { %2873 = vst.msk [vmem:[%s4944_s10 + $0x20] sm:$0xff] %vm2868_vm6, %v4660_v27  ;;  %v3589_v9 = vpop.f32.mrb[34].mxu0 }
0x2881   :  { %v4675_v26 = vadd.f32 %v3589_v9, %v4618_v18  ;;  %v2819_v30 = vpop.f32.mrb[35].mxu0 }
0x2882   :  { %v4678_v43 = vadd.f32 %v4618_v18, %v2819_v30 }
0x2883   :  { %2876 = vst.msk [vmem:[%s4944_s10 + $0x38] sm:$0xff] %vm2868_vm6, %v4675_v26 }
0x2884   :  { %2875 = vst.msk [vmem:[%s4944_s10 + $0x30] sm:$0xff] %vm2868_vm6, %v4678_v43  ;;  %v3592_v22 = vpop.f32.mrb[36].mxu0 }
0x2885   :  { %v4691_v56 = vadd.f32 %v3592_v22, %v4618_v18  ;;  %v2829_v5 = vpop.f32.mrb[37].mxu0 }
0x2886   :  { %v4694_v46 = vadd.f32 %v4618_v18, %v2829_v5 }
0x2887   :  { %2878 = vst.msk [vmem:[%s4944_s10 + $0x48] sm:$0xff] %vm2868_vm6, %v4691_v56 }
0x2888   :  { %2877 = vst.msk [vmem:[%s4944_s10 + $0x40] sm:$0xff] %vm2868_vm6, %v4694_v46  ;;  %v3595_v50 = vpop.f32.mrb[38].mxu0 }
0x2889   :  { %v4707_v58 = vadd.f32 %v3595_v50, %v4618_v18  ;;  %v2839_v54 = vpop.f32.mrb[39].mxu0 }
0x288a   :  { %v4710_v21 = vadd.f32 %v4618_v18, %v2839_v54  ;;  %v2885_v54 = vld [vmem:[%s4935_s1] sm:$0xff] }
0x288b   :  { %2880 = vst.msk [vmem:[%s4944_s10 + $0x58] sm:$0xff] %vm2868_vm6, %v4707_v58 }
0x288c   :  { %2879 = vst.msk [vmem:[%s4944_s10 + $0x50] sm:$0xff] %vm2868_vm6, %v4710_v21 }
0x28f0   :  { %v2478_v57 = vpop.permute.xlu1 %2477 }
0x28f1   :  { %v2482_v31 = vmul.f32 %v2478_v57, %v2470_v62  ;;  %v2476_v24 = vpop.permute.xlu0 %2475  ;;  %v2886_v57 = vld [vmem:[%s4935_s1 + $0x8] sm:$0xff] }
0x28f2   :  { %v2481_v60 = vmul.f32 %v2476_v24, %v2469_v39  ;;  %v2887_v24 = vld [vmem:[%s4935_s1 + $0x10] sm:$0xff] }
0x28f3   :  { %2487 = vrot.lane.b32.xlu1 %v2482_v31, %s3930_s15  ;;  %v2901_v31 = vsub.f32 %v4624_v25, %v2885_v54 }
0x28f4   :  { %2485 = vrot.lane.b32.xlu0 %v2481_v60, %s3930_s15  ;;  %v2902_v60 = vsub.f32 %v4621_v23, %v2886_v57  ;;  %v2890_v23 = vld [vmem:[%s4935_s1 + $0x28] sm:$0xff]  ;;  %v2899_v57 = vld [vmem:[%s4935_s1 + $0x70] sm:$0xff] }
0x2965   :  { %v2488_v32 = vpop.permute.xlu1 %2487 }
0x2966   :  { %v2492_v40 = vadd.f32 %v2488_v32, %v2472_v19  ;;  %v2486_v63 = vpop.permute.xlu0 %2485  ;;  %v2917_v19 = vmul.f32 %v2901_v31, %v2901_v31  ;;  %v2888_v32 = vld [vmem:[%s4935_s1 + $0x18] sm:$0xff] }
0x2967   :  { %v2491_v4 = vadd.f32 %v2486_v63, %v2471_v37  ;;  %v2903_v37 = vsub.f32 %v4640_v34, %v2887_v24  ;;  %v2918_v63 = vmul.f32 %v2902_v60, %v2902_v60  ;;  %v2904_v25 = vsub.f32 %v4637_v7, %v2888_v32  ;;  %v2891_v34 = vld [vmem:[%s4935_s1 + $0x30] sm:$0xff] }
0x2968   :  { %3871 = vtanh.f32 %v2492_v40 }
0x2969   :  { %3873 = vtanh.f32 %v2491_v4 }
0x2972   :  { %v3872_v8 = vpop.eup %3871 }
0x2973   :  { %v3874_v10 = vpop.eup %3873  ;;  %2499 = vrot.lane.b32.xlu1 %v3872_v8, %s3929_s5 }
0x2974   :  { %2497 = vrot.lane.b32.xlu0 %v3874_v10, %s3929_s5  ;;  %v2933_v10 = vsel %vm2868_vm6, %v2917_v19, 0.0 }
0x29e5   :  { %v2500_v61 = vpop.permute.xlu1 %2499 }
0x29e6   :  { %v2504_v1 = vmul.f32 %v2500_v61, %v2470_v62  ;;  %v2498_v2 = vpop.permute.xlu0 %2497  ;;  %v2920_v61 = vmul.f32 %v2904_v25, %v2904_v25 }
0x29e7   :  { %v2503_v12 = vmul.f32 %v2498_v2, %v2469_v39  ;;  %v2906_v2 = vsub.f32 %v4656_v48, %v2890_v23 }
0x29e8   :  { %2509 = vrot.lane.b32.xlu1 %v2504_v1, %s3930_s15  ;;  %v2936_v1 = vsel %vm2868_vm6, %v2918_v63, 0.0 }
0x29e9   :  { %2507 = vrot.lane.b32.xlu0 %v2503_v12, %s3930_s15  ;;  %v2907_v12 = vsub.f32 %v4678_v43, %v2891_v34  ;;  %v2922_v48 = vmul.f32 %v2906_v2, %v2906_v2 }
0x2a5a   :  { %v2510_v51 = vpop.permute.xlu1 %2509 }
0x2a5b   :  { %2514 = vst.msk [vmem:[#allocation3 + $0x68] sm:$0xff] %vm296_vm2, %v2510_v51  ;;  %v2508_v44 = vpop.permute.xlu0 %2507 }
0x2a5c   :  { %2513 = vst.msk [vmem:[#allocation3 + $0x60] sm:$0xff] %vm296_vm2, %v2508_v44  ;;  %3567 = vmatprep.mubr.msk.f32.mxu1 %vm296_vm2, %v2508_v44  ;;  %v2893_v44 = vld [vmem:[%s4935_s1 + $0x40] sm:$0xff] }
0x2a5d   :  { %3568 = vmatmul.mubr.msk.f32.vlgmr.msra.gmra.mrb[50].mxu1 %vm296_vm2, %v2510_v51  ;;  %v2909_v43 = vsub.f32 %v4694_v46, %v2893_v44  ;;  %v2896_v46 = vld [vmem:[%s4935_s1 + $0x58] sm:$0xff] }
0x2a62   :  { %v2661_v17 = vld [vmem:[#allocation3 + $0x68] sm:$0xff] }
0x2a63   :  { %v2660_v59 = vld [vmem:[#allocation3 + $0x60] sm:$0xff] }
0x2a64   :  { %3596 = vmatprep.mubr.msk.f32.mxu0 %vm296_vm2, %v2660_v59 }
0x2a65   :  { %3597 = vmatmul.mubr.msk.f32.gmra.mrb[40].mxu0 %vm296_vm2, %v2661_v17  ;;  %v2942_v17 = vsel %vm2868_vm6, %v2920_v61, 0.0 }
0x2b30   :  { %v3569_v14 = vpop.f32.mrb[50].mxu1 }
0x2b31   :  { %v2597_v16 = vadd.f32 %v3569_v14, %v4279_v52  ;;  %v2587_v13 = vpop.f32.mrb[51].mxu1  ;;  %v2923_v14 = vmul.f32 %v2907_v12, %v2907_v12 }
0x2b32   :  { %v2596_v49 = vadd.f32 %v2587_v13, %v4273_v45 }
0x2b33   :  { %3875 = vtanh.f32 %v2597_v16  ;;  %v2894_v16 = vld [vmem:[%s4935_s1 + $0x48] sm:$0xff] }
0x2b34   :  { %3877 = vtanh.f32 %v2596_v49  ;;  %v2895_v49 = vld [vmem:[%s4935_s1 + $0x50] sm:$0xff] }
0x2b38   :  { %v3598_v15 = vpop.f32.mrb[40].mxu0 }
0x2b39   :  { %v4739_v28 = vadd.f32 %v3598_v15, %v4618_v18  ;;  %v2849_v41 = vpop.f32.mrb[41].mxu0 }
0x2b3a   :  { %v4742_v6 = vadd.f32 %v4618_v18, %v2849_v41  ;;  %v2925_v41 = vmul.f32 %v2909_v43, %v2909_v43 }
0x2b3b   :  { %2882 = vst.msk [vmem:[%s4944_s10 + $0x68] sm:$0xff] %vm2868_vm6, %v4739_v28 }
0x2b3c   :  { %2881 = vst.msk [vmem:[%s4944_s10 + $0x60] sm:$0xff] %vm2868_vm6, %v4742_v6 }
0x2b3d   :  { %v3876_v45 = vpop.eup %3875 }
0x2b3e   :  { %v3878_v52 = vpop.eup %3877  ;;  %v2601_v11 = vmul.f32 %v3876_v45, %v4181_v42  ;;  %v2911_v45 = vsub.f32 %v4710_v21, %v2895_v49 }
0x2b3f   :  { %v2600_v20 = vmul.f32 %v3878_v52, %v4181_v42  ;;  %v2951_v52 = vsel %vm2868_vm6, %v2923_v14, 0.0 }
0x2b40   :  { %v2603_v55 = vadd.f32 %v2601_v11, %v4186_v47  ;;  %v2948_v11 = vsel %vm2868_vm6, %v2922_v48, 0.0  ;;  %v2927_v21 = vmul.f32 %v2911_v45, %v2911_v45 }
0x2b41   :  { %v2602_v33 = vadd.f32 %v2600_v20, %v4186_v47  ;;  %v2897_v20 = vld [vmem:[%s4935_s1 + $0x60] sm:$0xff] }
0x2b42   :  { %2610 = vrot.lane.b32.xlu1 %v2603_v55, %s3929_s5  ;;  %v2605_v53 = vmul.f32 %v2603_v55, %v2492_v40  ;;  %v2889_v40 = vld [vmem:[%s4935_s1 + $0x20] sm:$0xff] }
0x2b43   :  { %2608 = vrot.lane.b32.xlu0 %v2602_v33, %s3929_s5  ;;  %v2604_v62 = vmul.f32 %v2602_v33, %v2491_v4  ;;  %v2919_v4 = vmul.f32 %v2903_v37, %v2903_v37  ;;  %v2905_v8 = vsub.f32 %v4660_v27, %v2889_v40  ;;  %v2892_v27 = vld [vmem:[%s4935_s1 + $0x38] sm:$0xff] }
0x2b44   :  { %v2908_v59 = vsub.f32 %v4675_v26, %v2892_v27  ;;  %v2910_v26 = vsub.f32 %v4691_v56, %v2894_v16 }
0x2b45   :  { %v2921_v7 = vmul.f32 %v2905_v8, %v2905_v8  ;;  %v2939_v51 = vsel %vm2868_vm6, %v2919_v4, 0.0 }
0x2b46   :  { %v2924_v15 = vmul.f32 %v2908_v59, %v2908_v59 }
0x2b47   :  { %v2945_v13 = vsel %vm2868_vm6, %v2921_v7, 0.0 }
0x2b48   :  { %v2954_v56 = vsel %vm2868_vm6, %v2924_v15, 0.0 }
0x2bb4   :  { %v2611_v38 = vpop.permute.xlu1 %2610 }
0x2bb5   :  { %v2615_v0 = vmul.f32 %v2611_v38, %v2603_v55  ;;  %v2609_v3 = vpop.permute.xlu0 %2608  ;;  %v2913_v38 = vsub.f32 %v4742_v6, %v2897_v20 }
0x2bb6   :  { %v2614_v35 = vmul.f32 %v2609_v3, %v2602_v33  ;;  %v2898_v3 = vld [vmem:[%s4935_s1 + $0x68] sm:$0xff] }
0x2bb7   :  { %2620 = vrot.lane.b32.xlu1 %v2615_v0, %s3930_s15  ;;  %v2957_v0 = vsel %vm2868_vm6, %v2925_v41, 0.0 }
0x2bb8   :  { %2618 = vrot.lane.b32.xlu0 %v2614_v35, %s3930_s15 }
0x2c29   :  { %v2621_v36 = vpop.permute.xlu1 %2620 }
0x2c2a   :  { %v2625_v42 = vadd.f32 %v2621_v36, %v2605_v53  ;;  %v2619_v29 = vpop.permute.xlu0 %2618  ;;  %v2914_v36 = vsub.f32 %v4739_v28, %v2898_v3 }
0x2c2b   :  { %v2624_v39 = vadd.f32 %v2619_v29, %v2604_v62  ;;  %v2929_v62 = vmul.f32 %v2913_v38, %v2913_v38 }
0x2c2c   :  { %3879 = vtanh.f32 %v2625_v42  ;;  %v2963_v42 = vsel %vm2868_vm6, %v2927_v21, 0.0 }
0x2c2d   :  { %3881 = vtanh.f32 %v2624_v39  ;;  %v2969_v6 = vsel %vm2868_vm6, %v2929_v62, 0.0 }
0x2c36   :  { %v3880_v47 = vpop.eup %3879 }
0x2c37   :  { %v3882_v9 = vpop.eup %3881  ;;  %2632 = vrot.lane.b32.xlu1 %v3880_v47, %s3929_s5 }
0x2c38   :  { %2630 = vrot.lane.b32.xlu0 %v3882_v9, %s3929_s5 }
0x2ca9   :  { %v2633_v30 = vpop.permute.xlu1 %2632 }
0x2caa   :  { %v2637_v22 = vmul.f32 %v2633_v30, %v2603_v55  ;;  %v2631_v5 = vpop.permute.xlu0 %2630  ;;  %v2926_v55 = vmul.f32 %v2910_v26, %v2910_v26 }
0x2cab   :  { %v2636_v50 = vmul.f32 %v2631_v5, %v2602_v33  ;;  %v2912_v33 = vsub.f32 %v4707_v58, %v2896_v46  ;;  %v2930_v58 = vmul.f32 %v2914_v36, %v2914_v36  ;;  %v2900_v5 = vld [vmem:[%s4935_s1 + $0x78] sm:$0xff] }
0x2cac   :  { %2642 = vrot.lane.b32.xlu1 %v2637_v22, %s3930_s15  ;;  %v2960_v35 = vsel %vm2868_vm6, %v2926_v55, 0.0 }
0x2cad   :  { %2640 = vrot.lane.b32.xlu0 %v2636_v50, %s3930_s15  ;;  %v2928_v53 = vmul.f32 %v2912_v33, %v2912_v33  ;;  %v2972_v39 = vsel %vm2868_vm6, %v2930_v58, 0.0 }
0x2caf   :  { %v2966_v29 = vsel %vm2868_vm6, %v2928_v53, 0.0 }
0x2ccc   :  { %2934 = vadd.xlane.f32.xlu0 %v2933_v10 }
0x2cd0   :  { %2937 = vadd.xlane.f32.xlu1 %v2936_v1  ;;  %2940 = vadd.xlane.f32.xlu0 %v2939_v51 }
0x2cd4   :  { %2946 = vadd.xlane.f32.xlu1 %v2945_v13  ;;  %2943 = vadd.xlane.f32.xlu0 %v2942_v17 }
0x2cd8   :  { %2952 = vadd.xlane.f32.xlu1 %v2951_v52  ;;  %2949 = vadd.xlane.f32.xlu0 %v2948_v11 }
0x2cdc   :  { %2958 = vadd.xlane.f32.xlu1 %v2957_v0  ;;  %2955 = vadd.xlane.f32.xlu0 %v2954_v56 }
0x2ce0   :  { %2964 = vadd.xlane.f32.xlu1 %v2963_v42  ;;  %2961 = vadd.xlane.f32.xlu0 %v2960_v35 }
0x2ce4   :  { %2970 = vadd.xlane.f32.xlu1 %v2969_v6  ;;  %2967 = vadd.xlane.f32.xlu0 %v2966_v29 }
0x2ce8   :  { %2973 = vadd.xlane.f32.xlu0 %v2972_v39 }
0x2d1e   :  { %v2643_v47 = vpop.permute.xlu1 %2642 }
0x2d1f   :  { %2647 = vst.msk [vmem:[#allocation3 + $0x78] sm:$0xff] %vm296_vm2, %v2643_v47  ;;  %v2641_v9 = vpop.permute.xlu0 %2640 }
0x2d20   :  { %2646 = vst.msk [vmem:[#allocation3 + $0x70] sm:$0xff] %vm296_vm2, %v2641_v9 }
0x2d26   :  { %v2663_v30 = vld [vmem:[#allocation3 + $0x78] sm:$0xff] }
0x2d27   :  { %v2662_v28 = vld [vmem:[#allocation3 + $0x70] sm:$0xff] }
0x2d28   :  { %3599 = vmatprep.mubr.msk.f32.mxu0 %vm296_vm2, %v2662_v28 }
0x2d29   :  { %3600 = vmatmul.mubr.msk.f32.gmra.mrb[42].mxu0 %vm296_vm2, %v2663_v30 }
0x2d5d   :  { %v2938_v63 = vpop.xlane.xlu1 %2937 }
0x2d5e   :  { %3883 = vrsqrt.f32 %v2938_v63  ;;  %vm2990_vm7 = vcmp.eq.f32.partialorder %v2938_v63, inf  ;;  %v2993_v12 = vand.u32 2147483648, %v2938_v63  ;;  %vm2992_vm9 = vcmp.eq.f32.partialorder %v2938_v63, 0.0 }
0x2d61   :  { %v2947_v10 = vpop.xlane.xlu1 %2946 }
0x2d62   :  { %vm3011_vm0 = vcmp.eq.f32.partialorder %v2947_v10, inf  ;;  %v3014_v62 = vand.u32 2147483648, %v2947_v10  ;;  %vm3013_vm2 = vcmp.eq.f32.partialorder %v2947_v10, 0.0 }
0x2d65   :  { %v4861_v59 = vpop.xlane.xlu1 %2952 }
0x2d66   :  { %vm3025_vm4 = vcmp.eq.f32.partialorder %v4861_v59, inf }
0x2d68   :  { %v3884_v8 = vpop.eup %3883 }
0x2d69   :  { %v2989_v34 = vmul.f32 %v3884_v8, %v2938_v63  ;;  %v4869_v56 = vpop.xlane.xlu1 %2958 }
0x2d6b   :  { %v2991_v7 = vsel %vm2990_vm7, %v2938_v63, %v2989_v34 }
0x2d6c   :  { %v2994_v48 = vsel %vm2992_vm9, %v2993_v12, %v2991_v7 }
0x2d6d   :  { %v3095_v13 = vsel %vm3093_vm11, %v2994_v48, 0.0  ;;  %v2965_v9 = vpop.xlane.xlu1 %2964 }
0x2d71   :  { %v2971_v63 = vpop.xlane.xlu1 %2970 }
0x2dfc   :  { %v3601_v22 = vpop.f32.mrb[42].mxu0 }
0x2dfd   :  { %v2865_v50 = vadd.f32 %v3601_v22, %v4618_v18  ;;  %v2859_v54 = vpop.f32.mrb[43].mxu0 }
0x2dfe   :  { %v2860_v31 = vadd.f32 %v4618_v18, %v2859_v54  ;;  %v2935_v18 = vpop.xlane.xlu0 %2934 }
0x2dff   :  { %2884 = vst.msk [vmem:[%s4944_s10 + $0x78] sm:$0xff] %vm2868_vm6, %v2865_v50  ;;  %v2916_v24 = vsub.f32 %v2865_v50, %v2900_v5  ;;  %3885 = vrsqrt.f32 %v2935_v18  ;;  %vm2983_vm8 = vcmp.eq.f32.partialorder %v2935_v18, inf  ;;  %v2986_v17 = vand.u32 2147483648, %v2935_v18 }
0x2e00   :  { %2883 = vst.msk [vmem:[%s4944_s10 + $0x70] sm:$0xff] %vm2868_vm6, %v2860_v31  ;;  %v2915_v60 = vsub.f32 %v2860_v31, %v2899_v57  ;;  %vm2985_vm10 = vcmp.eq.f32.partialorder %v2935_v18, 0.0 }
0x2e01   :  { %v2932_v19 = vmul.f32 %v2916_v24, %v2916_v24  ;;  %v3028_v24 = vand.u32 2147483648, %v4861_v59 }
0x2e02   :  { %v2931_v32 = vmul.f32 %v2915_v60, %v2915_v60  ;;  %v2941_v25 = vpop.xlane.xlu0 %2940 }
0x2e03   :  { %v2978_v37 = vsel %vm2868_vm6, %v2932_v19, 0.0  ;;  %3887 = vrsqrt.f32 %v2941_v25  ;;  %vm2997_vm12 = vcmp.eq.f32.partialorder %v2941_v25, inf  ;;  %v3000_v26 = vand.u32 2147483648, %v2941_v25 }
0x2e04   :  { %2979 = vadd.xlane.f32.xlu0 %v2978_v37  ;;  %v2975_v40 = vsel %vm2868_vm6, %v2931_v32, 0.0  ;;  %vm2999_vm14 = vcmp.eq.f32.partialorder %v2941_v25, 0.0  ;;  %vm3027_vm6 = vcmp.eq.f32.partialorder %v4861_v59, 0.0 }
0x2e05   :  { %2976 = vadd.xlane.f32.xlu1 %v2975_v40 }
0x2e06   :  { %v2944_v4 = vpop.xlane.xlu0 %2943 }
0x2e07   :  { %3889 = vrsqrt.f32 %v2944_v4  ;;  %vm3004_vm13 = vcmp.eq.f32.partialorder %v2944_v4, inf  ;;  %v3007_v20 = vand.u32 2147483648, %v2944_v4  ;;  %vm3006_vm15 = vcmp.eq.f32.partialorder %v2944_v4, 0.0 }
0x2e08   :  { %3891 = vrsqrt.f32 %v2947_v10 }
0x2e09   :  { %v3886_v23 = vpop.eup %3885 }
0x2e0a   :  { %v4858_v61 = vpop.xlane.xlu0 %2949  ;;  %v2982_v1 = vmul.f32 %v3886_v23, %v2935_v18 }
0x2e0b   :  { %3893 = vrsqrt.f32 %v4858_v61  ;;  %vm3018_vm1 = vcmp.eq.f32.partialorder %v4858_v61, inf  ;;  %v3021_v39 = vand.u32 2147483648, %v4858_v61  ;;  %vm3020_vm3 = vcmp.eq.f32.partialorder %v4858_v61, 0.0 }
0x2e0c   :  { %v2984_v51 = vsel %vm2983_vm8, %v2935_v18, %v2982_v1  ;;  %3895 = vrsqrt.f32 %v4861_v59  ;;  %vm3039_vm8 = vcmp.eq.f32.partialorder %v4869_v56, inf }
0x2e0d   :  { %v3888_v2 = vpop.eup %3887  ;;  %v2987_v43 = vsel %vm2985_vm10, %v2986_v17, %v2984_v51  ;;  %vm3041_vm10 = vcmp.eq.f32.partialorder %v4869_v56, 0.0 }
0x2e0e   :  { %v2996_v44 = vmul.f32 %v3888_v2, %v2941_v25  ;;  %v4863_v16 = vpop.xlane.xlu0 %2955  ;;  %v3094_v41 = vsel %vm3093_vm11, %v2987_v43, 0.0  ;;  %v3042_v2 = vand.u32 2147483648, %v4869_v56 }
0x2e0f   :  { %3897 = vrsqrt.f32 %v4863_v16  ;;  %v3096_v11 = vadd.f32 %v3095_v13, %v3094_v41  ;;  %vm3032_vm5 = vcmp.eq.f32.partialorder %v4863_v16, inf  ;;  %v3035_v40 = vand.u32 2147483648, %v4863_v16 }
0x2e10   :  { %v2998_v49 = vsel %vm2997_vm12, %v2941_v25, %v2996_v44  ;;  %3899 = vrsqrt.f32 %v4869_v56  ;;  %vm3034_vm7 = vcmp.eq.f32.partialorder %v4863_v16, 0.0 }
0x2e11   :  { %v3890_v27 = vpop.eup %3889  ;;  %v3001_v46 = vsel %vm2999_vm14, %v3000_v26, %v2998_v49 }
0x2e12   :  { %v3003_v14 = vmul.f32 %v3890_v27, %v2944_v4  ;;  %v3892_v15 = vpop.eup %3891  ;;  %v3097_v21 = vsel %vm3093_vm11, %v3001_v46, 0.0  ;;  %v4873_v0 = vpop.xlane.xlu0 %2961 }
0x2e13   :  { %v3010_v55 = vmul.f32 %v3892_v15, %v2947_v10  ;;  %v3098_v3 = vadd.f32 %v3097_v21, %v3096_v11  ;;  %3901 = vrsqrt.f32 %v4873_v0  ;;  %vm3046_vm9 = vcmp.eq.f32.partialorder %v4873_v0, inf }
0x2e14   :  { %v3005_v45 = vsel %vm3004_vm13, %v2944_v4, %v3003_v14  ;;  %3903 = vrsqrt.f32 %v2965_v9  ;;  %v3049_v44 = vand.u32 2147483648, %v4873_v0  ;;  %vm3048_vm12 = vcmp.eq.f32.partialorder %v4873_v0, 0.0 }
0x2e15   :  { %v3894_v52 = vpop.eup %3893  ;;  %v3008_v33 = vsel %vm3006_vm15, %v3007_v20, %v3005_v45  ;;  %v3012_v35 = vsel %vm3011_vm0, %v2947_v10, %v3010_v55  ;;  %vm3053_vm13 = vcmp.eq.f32.partialorder %v2965_v9, inf  ;;  %v3056_v15 = vand.u32 2147483648, %v2965_v9 }
0x2e16   :  { %v3017_v38 = vmul.f32 %v3894_v52, %v4858_v61  ;;  %v3099_v53 = vsel %vm3093_vm11, %v3008_v33, 0.0  ;;  %v3896_v36 = vpop.eup %3895  ;;  %v3015_v6 = vsel %vm3013_vm2, %v3014_v62, %v3012_v35  ;;  %v4885_v5 = vpop.xlane.xlu0 %2967  ;;  %vm3055_vm15 = vcmp.eq.f32.partialorder %v2965_v9, 0.0 }
0x2e17   :  { %v3100_v29 = vadd.f32 %v3099_v53, %v3098_v3  ;;  %v3024_v47 = vmul.f32 %v3896_v36, %v4861_v59  ;;  %v3101_v30 = vsel %vm3093_vm11, %v3015_v6, 0.0  ;;  %3905 = vrsqrt.f32 %v4885_v5 }
0x2e18   :  { %v3019_v42 = vsel %vm3018_vm1, %v4858_v61, %v3017_v38  ;;  %3907 = vrsqrt.f32 %v2971_v63  ;;  %vm3060_vm14 = vcmp.eq.f32.partialorder %v4885_v5, inf  ;;  %v3063_v52 = vand.u32 2147483648, %v4885_v5 }
0x2e19   :  { %v3898_v58 = vpop.eup %3897  ;;  %v3022_v28 = vsel %vm3020_vm3, %v3021_v39, %v3019_v42  ;;  %v3102_v50 = vadd.f32 %v3101_v30, %v3100_v29  ;;  %v3026_v54 = vsel %vm3025_vm4, %v4861_v59, %v3024_v47  ;;  %vm3062_vm0 = vcmp.eq.f32.partialorder %v4885_v5, 0.0 }
0x2e1a   :  { %v3031_v22 = vmul.f32 %v3898_v58, %v4863_v16  ;;  %v3103_v57 = vsel %vm3093_vm11, %v3022_v28, 0.0  ;;  %v3900_v31 = vpop.eup %3899  ;;  %v3029_v32 = vsel %vm3027_vm6, %v3028_v24, %v3026_v54  ;;  %v2974_v10 = vpop.xlane.xlu0 %2973  ;;  %vm3067_vm1 = vcmp.eq.f32.partialorder %v2971_v63, inf }
0x2e1b   :  { %v3104_v37 = vadd.f32 %v3103_v57, %v3102_v50  ;;  %v3038_v18 = vmul.f32 %v3900_v31, %v4869_v56  ;;  %v3105_v4 = vsel %vm3093_vm11, %v3029_v32, 0.0  ;;  %3909 = vrsqrt.f32 %v2974_v10 }
0x2e1c   :  { %v3033_v60 = vsel %vm3032_vm5, %v4863_v16, %v3031_v22  ;;  %v3070_v35 = vand.u32 2147483648, %v2971_v63  ;;  %vm3074_vm2 = vcmp.eq.f32.partialorder %v2974_v10, inf  ;;  %vm3069_vm3 = vcmp.eq.f32.partialorder %v2971_v63, 0.0 }
0x2e1d   :  { %v3902_v19 = vpop.eup %3901  ;;  %v3036_v25 = vsel %vm3034_vm7, %v3035_v40, %v3033_v60  ;;  %v3106_v23 = vadd.f32 %v3105_v4, %v3104_v37  ;;  %v3040_v34 = vsel %vm3039_vm8, %v4869_v56, %v3038_v18  ;;  %v3077_v36 = vand.u32 2147483648, %v2974_v10 }
0x2e1e   :  { %v3045_v8 = vmul.f32 %v3902_v19, %v4873_v0  ;;  %v3107_v61 = vsel %vm3093_vm11, %v3036_v25, 0.0  ;;  %v3904_v1 = vpop.eup %3903  ;;  %v3043_v12 = vsel %vm3041_vm10, %v3042_v2, %v3040_v34  ;;  %vm3076_vm4 = vcmp.eq.f32.partialorder %v2974_v10, 0.0 }
0x2e1f   :  { %v3108_v51 = vadd.f32 %v3107_v61, %v3106_v23  ;;  %v3052_v59 = vmul.f32 %v3904_v1, %v2965_v9  ;;  %v3109_v48 = vsel %vm3093_vm11, %v3043_v12, 0.0 }
0x2e20   :  { %v3047_v7 = vsel %vm3046_vm9, %v4873_v0, %v3045_v8 }
0x2e21   :  { %v3906_v27 = vpop.eup %3905  ;;  %v3050_v17 = vsel %vm3048_vm12, %v3049_v44, %v3047_v7  ;;  %v3110_v16 = vadd.f32 %v3109_v48, %v3108_v51  ;;  %v3054_v43 = vsel %vm3053_vm13, %v2965_v9, %v3052_v59 }
0x2e22   :  { %v3059_v14 = vmul.f32 %v3906_v27, %v4885_v5  ;;  %v3111_v13 = vsel %vm3093_vm11, %v3050_v17, 0.0  ;;  %v3908_v49 = vpop.eup %3907  ;;  %v3057_v45 = vsel %vm3055_vm15, %v3056_v15, %v3054_v43 }
0x2e23   :  { %v3112_v46 = vadd.f32 %v3111_v13, %v3110_v16  ;;  %v3066_v20 = vmul.f32 %v3908_v49, %v2971_v63  ;;  %v3113_v21 = vsel %vm3093_vm11, %v3057_v45, 0.0 }
0x2e24   :  { %v3061_v26 = vsel %vm3060_vm14, %v4885_v5, %v3059_v14 }
0x2e25   :  { %v3910_v41 = vpop.eup %3909  ;;  %v3064_v56 = vsel %vm3062_vm0, %v3063_v52, %v3061_v26  ;;  %v3114_v38 = vadd.f32 %v3113_v21, %v3112_v46  ;;  %v3068_v0 = vsel %vm3067_vm1, %v2971_v63, %v3066_v20 }
0x2e26   :  { %v3073_v33 = vmul.f32 %v3910_v41, %v2974_v10  ;;  %v3115_v3 = vsel %vm3093_vm11, %v3064_v56, 0.0  ;;  %v3071_v62 = vsel %vm3069_vm3, %v3070_v35, %v3068_v0 }
0x2e27   :  { %v3116_v42 = vadd.f32 %v3115_v3, %v3114_v38  ;;  %v3117_v29 = vsel %vm3093_vm11, %v3071_v62, 0.0 }
0x2e28   :  { %v3075_v53 = vsel %vm3074_vm2, %v2974_v10, %v3073_v33 }
0x2e29   :  { %v3078_v58 = vsel %vm3076_vm4, %v3077_v36, %v3075_v53  ;;  %v3118_v9 = vadd.f32 %v3117_v29, %v3116_v42 }
0x2e2a   :  { %v3119_v30 = vsel %vm3093_vm11, %v3078_v58, 0.0 }
0x2e2b   :  { %v3120_v24 = vadd.f32 %v3119_v30, %v3118_v9 }
0x2e91   :  { %v2980_v11 = vpop.xlane.xlu0 %2979 }
0x2e92   :  { %3911 = vrsqrt.f32 %v2980_v11  ;;  %v2977_v55 = vpop.xlane.xlu1 %2976  ;;  %vm3088_vm5 = vcmp.eq.f32.partialorder %v2980_v11, inf  ;;  %v3091_v22 = vand.u32 2147483648, %v2980_v11  ;;  %vm3090_vm8 = vcmp.eq.f32.partialorder %v2980_v11, 0.0 }
0x2e93   :  { %3913 = vrsqrt.f32 %v2977_v55  ;;  %vm3081_vm6 = vcmp.eq.f32.partialorder %v2977_v55, inf  ;;  %v3084_v5 = vand.u32 2147483648, %v2977_v55  ;;  %vm3083_vm7 = vcmp.eq.f32.partialorder %v2977_v55, 0.0 }
0x2e9c   :  { %v3912_v6 = vpop.eup %3911 }
0x2e9d   :  { %v3914_v39 = vpop.eup %3913  ;;  %v3087_v47 = vmul.f32 %v3912_v6, %v2980_v11 }
0x2e9e   :  { %v3080_v28 = vmul.f32 %v3914_v39, %v2977_v55 }
0x2e9f   :  { %v3089_v50 = vsel %vm3088_vm5, %v2980_v11, %v3087_v47 }
0x2ea0   :  { %v3082_v54 = vsel %vm3081_vm6, %v2977_v55, %v3080_v28  ;;  %v3092_v31 = vsel %vm3090_vm8, %v3091_v22, %v3089_v50 }
0x2ea1   :  { %v3085_v57 = vsel %vm3083_vm7, %v3084_v5, %v3082_v54  ;;  %v3123_v32 = vsel %vm3093_vm11, %v3092_v31, 0.0 }
0x2ea2   :  { %v3121_v60 = vsel %vm3093_vm11, %v3085_v57, 0.0 }
0x2ea3   :  { %v3122_v19 = vadd.f32 %v3121_v60, %v3120_v24 }
0x2ea5   :  { %v3124_v37 = vadd.f32 %v3123_v32, %v3122_v19 }
0x2ea7   :  { %3125 = vadd.xlane.f32.xlu1 %v3124_v37 }
0x2f34   :  { %v3126_v40 = vpop.xlane.xlu1 %3125 }
0x2f35   :  { %v3127_v18 = vrot.slane %v3126_v40, 4 }
0x2f37   :  { %v3128_v63 = vadd.f32 %v3127_v18, %v3126_v40 }
0x2f39   :  { %v3129_v25 = vrot.slane %v3128_v63, 2 }
0x2f3b   :  { %v3130_v4 = vadd.f32 %v3129_v25, %v3128_v63 }
0x2f3d   :  { %v3131_v8 = vrot.slane %v3130_v4, 1 }
0x2f3f   :  { %v3132_v10 = vadd.f32 %v3131_v8, %v3130_v4 }
0x2f41   :  { %3748 = vpush %v3132_v10 }
0x2f72   :  { %s3749_s1 = spop %3748 }
0x2f73   :  { %s3134_s10 = smul.f32 0.0625, %s3749_s1 }
0x2f75   :  { %3136 = sst [smem:[#allocation4]] %s3134_s10 }
0x2f76   :  { %3924 = shalt.err (!%p3921_p2)
}
0x2f77   :  { %s3931_s23 = smov [#allocation4]  }
0x2f78   :  { %3146 = dma.smem_to_hbm %s3931_s23, 16, %s4945_s11, [#allocation5]  }
0x2f79   :  { %3925 = dma.done.wait [#allocation5], 16  }
0x2f7a   :  { %3926 = vsyncadd [#allocation5], 4294967280 }
0x2f7b   :  { %3152 = sfence }
0x2f7c   :  { %3153 = vsyncpa [#allocation5], 1 }

</bundles_post_ra>
